<compile_context>
chip_gen: v5e
topology: v5e:2x2
jax: 0.10.0
libtpu: 0.0.40
codegen_flags: <defaults>
</compile_context>

<pallas_src>
import functools
import math

import jax
import jax.numpy as jnp
from jax.experimental import pallas as pl
from jax.experimental.pallas import tpu as pltpu


def _round_up(x, m):
    return (x + m - 1) // m * m


# ---------------------------------------------------------------------------
# Pallas kernel 1: tiled matmul + fused bias (the transposed conv uses it)
# ---------------------------------------------------------------------------
def _matmul_bias_kernel(a_ref, b_ref, bias_ref, o_ref, acc_ref):
    @pl.when(pl.program_id(2) == 0)
    def _():
        acc_ref[...] = jnp.zeros_like(acc_ref)

    acc_ref[...] += jnp.dot(a_ref[...], b_ref[...],
                            preferred_element_type=jnp.float32)

    @pl.when(pl.program_id(2) == pl.num_programs(2) - 1)
    def _():
        o_ref[...] = (acc_ref[...] + bias_ref[...]).astype(o_ref.dtype)


def matmul_bias(a, b, bias=None, *, tm=256, tk=512, tn=256):
    """a:(M,K), b:(K,N), bias:(N,)|None -> (M,N) f32. bf16 MXU operands, f32 acc."""
    M, K = a.shape
    K2, N = b.shape
    assert K == K2
    if bias is None:
        bias = jnp.zeros((N,), jnp.float32)
    # Adaptive tiles: never pad tiny M/K/N all the way up to the default tile.
    tm = min(tm, _round_up(M, 8))
    tk = min(tk, _round_up(K, 128))
    tn = min(tn, _round_up(N, 128))
    Mp, Kp, Np = _round_up(M, tm), _round_up(K, tk), _round_up(N, tn)

    a = a.astype(jnp.bfloat16)
    b = b.astype(jnp.bfloat16)
    bias = bias.astype(jnp.float32)
    if (Mp, Kp) != (M, K):
        a = jnp.pad(a, ((0, Mp - M), (0, Kp - K)))
    if (Kp, Np) != (K, N):
        b = jnp.pad(b, ((0, Kp - K), (0, Np - N)))
    if Np != N:
        bias = jnp.pad(bias, (0, Np - N))
    bias = bias.reshape(1, Np)

    out = pl.pallas_call(
        _matmul_bias_kernel,
        out_shape=jax.ShapeDtypeStruct((Mp, Np), jnp.float32),
        grid_spec=pltpu.PrefetchScalarGridSpec(
            num_scalar_prefetch=0,
            grid=(Mp // tm, Np // tn, Kp // tk),
            in_specs=[
                pl.BlockSpec((tm, tk), lambda i, j, k: (i, k)),
                pl.BlockSpec((tk, tn), lambda i, j, k: (k, j)),
                pl.BlockSpec((1, tn), lambda i, j, k: (0, j)),
            ],
            out_specs=pl.BlockSpec((tm, tn), lambda i, j, k: (i, j)),
            scratch_shapes=[pltpu.VMEM((tm, tn), jnp.float32)],
        ),
        compiler_params=pltpu.CompilerParams(
            dimension_semantics=("parallel", "parallel", "arbitrary")),
    )(a, b, bias)
    if (Mp, Np) != (M, N):
        out = out[:M, :N]
    return out


# ---------------------------------------------------------------------------
# Pallas kernels 2/3: SELayer (avg-pool + FC + sigmoid, then channel scaling)
# ---------------------------------------------------------------------------
def _se_scale_kernel(x_ref, w1_ref, w2_ref, o_ref, acc_ref, *, inv_s):
    j = pl.program_id(1)

    @pl.when(j == 0)
    def _():
        acc_ref[...] = jnp.zeros_like(acc_ref)

    # x block: (1, ts, C) -> per-channel partial sum (1, C)
    acc_ref[...] += jnp.sum(x_ref[...], axis=1)

    @pl.when(j == pl.num_programs(1) - 1)
    def _():
        mean = acc_ref[...] * inv_s                                    # (1, C)
        h = jnp.maximum(
            jnp.dot(mean, w1_ref[...], preferred_element_type=jnp.float32), 0.0)
        y = jax.nn.sigmoid(
            jnp.dot(h, w2_ref[...], preferred_element_type=jnp.float32))
        o_ref[0] = y                                                   # (1, C)


def _scale_mul_kernel(x_ref, s_ref, o_ref):
    o_ref[...] = x_ref[...] * s_ref[...]          # (1, ts, C) * (1, 1, C)


def se_layer(x, w1, w2):
    """x: (N, D, H, W, C) channels-last.  Returns x * sigmoid(FC(relu(FC(avg(x)))))."""
    n, d, h, w_, c = x.shape
    cr = w1.shape[1]
    s = d * h * w_
    ts = min(2048, _round_up(s, 8))
    sp = _round_up(s, ts)
    x2 = x.reshape(n, s, c)
    if sp != s:
        x2 = jnp.pad(x2, ((0, 0), (0, sp - s), (0, 0)))  # zeros: sum unaffected
    n_chunks = sp // ts

    scale = pl.pallas_call(
        functools.partial(_se_scale_kernel, inv_s=1.0 / s),
        out_shape=jax.ShapeDtypeStruct((n, 1, c), jnp.float32),
        grid_spec=pltpu.PrefetchScalarGridSpec(
            num_scalar_prefetch=0,
            grid=(n, n_chunks),
            in_specs=[
                pl.BlockSpec((1, ts, c), lambda i, j: (i, j, 0)),
                pl.BlockSpec((c, cr), lambda i, j: (0, 0)),
                pl.BlockSpec((cr, c), lambda i, j: (0, 0)),
            ],
            out_specs=pl.BlockSpec((1, 1, c), lambda i, j: (i, 0, 0)),
            scratch_shapes=[pltpu.VMEM((1, c), jnp.float32)],
        ),
        compiler_params=pltpu.CompilerParams(
            dimension_semantics=("parallel", "arbitrary")),
    )(x2, w1, w2)

    out = pl.pallas_call(
        _scale_mul_kernel,
        out_shape=jax.ShapeDtypeStruct((n, sp, c), jnp.float32),
        grid=(n, n_chunks),
        in_specs=[pl.BlockSpec((1, ts, c), lambda i, j: (i, j, 0)),
                  pl.BlockSpec((1, 1, c), lambda i, j: (i, 0, 0))],
        out_specs=pl.BlockSpec((1, ts, c), lambda i, j: (i, j, 0)),
        compiler_params=pltpu.CompilerParams(
            dimension_semantics=("parallel", "parallel")),
    )(x2, scale)
    return out[:, :s, :].reshape(n, d, h, w_, c)


# ---------------------------------------------------------------------------
# ConvTranspose3d(kernel=4, stride=2, padding=1) as one Pallas matmul
# ---------------------------------------------------------------------------
# For output index od = 2*q + r (r in {0,1}) the valid (input, tap) pairs are
#   r=0:  (id=q-1, kd=3), (id=q,   kd=1)
#   r=1:  (id=q,   kd=2), (id=q+1, kd=0)
# so with the input zero-padded by 1, output block q only needs the padded
# window positions q, q+1, q+2.  Tap-selection matrix sel[t, r, kd]:
def _tap_selection():
    sel = jnp.zeros((3, 2, 4), jnp.float32)
    sel = sel.at[0, 0, 3].set(1.0)
    sel = sel.at[1, 0, 1].set(1.0)
    sel = sel.at[1, 1, 2].set(1.0)
    sel = sel.at[2, 1, 0].set(1.0)
    return sel


def conv_transpose3d_k4s2p1(x, w, b):
    """x:(N,D,H,W,Cin) channels-last, w:(Cin,Cout,4,4,4), b:(Cout,) ->
    (N,2D,2H,2W,Cout)."""
    # TODO(synk): specialized to kernel=4, stride=2, padding=1 (the module's
    # configuration); other kernel geometries need a different decomposition.
    n, d, h, w_, cin = x.shape
    cout = w.shape[1]

    xp = jnp.pad(x, ((0, 0), (1, 1), (1, 1), (1, 1), (0, 0)))
    cols = []
    for a in range(3):
        for bb in range(3):
            for cc in range(3):
                cols.append(xp[:, a:a + d, bb:bb + h, cc:cc + w_, :])
    patches = jnp.concatenate(cols, axis=-1).reshape(n * d * h * w_, 27 * cin)

    sel = _tap_selection()
    # wbig[tap_d,tap_h,tap_w, ci, r_d,r_h,r_w, co]
    wbig = jnp.einsum('adp,beq,cfr,iopqr->abcidefo',
                      sel, sel, sel, w.astype(jnp.float32))
    wmat = wbig.reshape(27 * cin, 8 * cout)
    bias = jnp.tile(b.astype(jnp.float32), 8)      # b[co] for each of 8 parities

    y = matmul_bias(patches, wmat, bias)           # (N*D*H*W, 8*Cout)
    y = y.reshape(n, d, h, w_, 2, 2, 2, cout)
    y = jnp.transpose(y, (0, 1, 4, 2, 5, 3, 6, 7))  # interleave sub-pixels
    return y.reshape(n, 2 * d, 2 * h, 2 * w_, cout)


# ---------------------------------------------------------------------------
# Forward pass (mirrors AutoMerge_noalter.forward) and pure-JAX reference
# ---------------------------------------------------------------------------
def automerge_forward(params, x_ncdhw):
    x = jnp.transpose(x_ncdhw, (0, 2, 3, 4, 1)).astype(jnp.float32)  # NDHWC
    x = se_layer(x, params['w1'], params['w2'])
    out = conv_transpose3d_k4s2p1(x, params['wt'], params['bt'])
    return jnp.transpose(out, (0, 4, 1, 2, 3))                       # NCDHW


def reference_forward(params, x_ncdhw):
    x = x_ncdhw.astype(jnp.float32)
    pooled = jnp.mean(x, axis=(2, 3, 4))                             # (N, C)
    hid = jax.nn.relu(pooled @ params['w1'])
    y = jax.nn.sigmoid(hid @ params['w2'])
    xs = x * y[:, :, None, None, None]
    rhs = jnp.flip(jnp.transpose(params['wt'], (1, 0, 2, 3, 4)), axis=(2, 3, 4))
    out = jax.lax.conv_general_dilated(
        xs, rhs, window_strides=(1, 1, 1), padding=[(2, 2)] * 3,
        lhs_dilation=(2, 2, 2),
        dimension_numbers=('NCDHW', 'OIDHW', 'NCDHW'))
    return out + params['bt'][None, :, None, None, None]


def init_params(key, in_ch=8, inter_ch=1, reduction=1):
    k1, k2, k3, k4 = jax.random.split(key, 4)
    cr = in_ch // reduction
    return dict(
        w1=jax.random.normal(k1, (in_ch, cr), jnp.float32) / math.sqrt(in_ch),
        w2=jax.random.normal(k2, (cr, in_ch), jnp.float32) / math.sqrt(cr),
        wt=jax.random.normal(k3, (in_ch, inter_ch, 4, 4, 4), jnp.float32)
        / math.sqrt(in_ch * 64),
        bt=jax.random.normal(k4, (inter_ch,), jnp.float32) * 0.01,
    )


# ---------------------------------------------------------------------------
if __name__ == "__main__":
    key = jax.random.PRNGKey(0)
    pkey, xkey = jax.random.split(key)
    in_ch, inter_ch = 8, 1
    params = init_params(pkey, in_ch=in_ch, inter_ch=inter_ch, reduction=1)
    x = jax.random.normal(xkey, (2, in_ch, 8, 8, 8), jnp.float32)    # NCDHW

    fwd = jax.jit(automerge_forward)
    out = jax.block_until_ready(fwd(params, x))

    assert out.shape == (2, inter_ch, 16, 16, 16), out.shape
    assert bool(jnp.isfinite(out).all())

    ref = reference_forward(params, x)
    max_err = float(jnp.max(jnp.abs(out - ref)))
    assert max_err < 2e-2, f"max abs error vs reference: {max_err}"
    print("KERNEL_OK")
</pallas_src>

<mosaic_0001>
module attributes {stable_mosaic.version = 11 : i64} {
  func.func @_scale_mul_kernel(%arg0: i32, %arg1: i32, %arg2: memref<1x512x8xf32, #tpu.memory_space<vmem>>, %arg3: memref<1x1x8xf32, #tpu.memory_space<vmem>>, %arg4: memref<1x512x8xf32, #tpu.memory_space<vmem>>) attributes {dimension_semantics = [#tpu.dimension_semantics<parallel>, #tpu.dimension_semantics<parallel>], iteration_bounds = array<i64: 2, 1>, scalar_prefetch = 0 : i64, scratch_operands = 0 : i64, tpu.core_type = #tpu.core_type<tc>, window_params = [{transform_indices = @transform_0, window_bounds = array<i64: 1, 512, 8>}, {transform_indices = @transform_1, window_bounds = array<i64: 1, 1, 8>}, {transform_indices = @transform_2, window_bounds = array<i64: 1, 512, 8>}]} {
    %c0 = arith.constant 0 : index
    %c0_0 = arith.constant 0 : index
    %c0_1 = arith.constant 0 : index
    %0 = vector.load %arg2[%c0, %c0_0, %c0_1] : memref<1x512x8xf32, #tpu.memory_space<vmem>>, vector<1x512x8xf32>
    %c0_2 = arith.constant 0 : index
    %c0_3 = arith.constant 0 : index
    %c0_4 = arith.constant 0 : index
    %1 = vector.load %arg3[%c0_2, %c0_3, %c0_4] : memref<1x1x8xf32, #tpu.memory_space<vmem>>, vector<1x1x8xf32>
    %2 = vector.broadcast %1 : vector<1x1x8xf32> to vector<1x512x8xf32>
    %3 = arith.mulf %0, %2 : vector<1x512x8xf32>
    %c0_5 = arith.constant 0 : index
    %c0_6 = arith.constant 0 : index
    %c0_7 = arith.constant 0 : index
    %4 = vector.load %arg4[%c0_5, %c0_6, %c0_7] : memref<1x512x8xf32, #tpu.memory_space<vmem>>, vector<1x512x8xf32>
    tpu.vector_store %arg4[%c0_5, %c0_6, %c0_7], %3 {strides = array<i32>} : memref<1x512x8xf32, #tpu.memory_space<vmem>>, vector<1x512x8xf32>,
    return
  }
  func.func @transform_0(%arg0: i32, %arg1: i32) -> (i32, i32, i32) {
    %c0_i32 = arith.constant 0 : i32
    %c0_i32_0 = arith.constant 0 : i32
    return %arg0, %arg1, %c0_i32 : i32, i32, i32
  }
  func.func @transform_1(%arg0: i32, %arg1: i32) -> (i32, i32, i32) {
    %c0_i32 = arith.constant 0 : i32
    %c0_i32_0 = arith.constant 0 : i32
    %c0_i32_1 = arith.constant 0 : i32
    return %arg0, %c0_i32, %c0_i32_0 : i32, i32, i32
  }
  func.func @transform_2(%arg0: i32, %arg1: i32) -> (i32, i32, i32) {
    %c0_i32 = arith.constant 0 : i32
    %c0_i32_0 = arith.constant 0 : i32
    return %arg0, %arg1, %c0_i32 : i32, i32, i32
  }
}

module attributes {stable_mosaic.version = 11 : i64} {
  func.func @_se_scale_kernel(%arg0: i32, %arg1: i32, %arg2: memref<1x512x8xf32, #tpu.memory_space<vmem>>, %arg3: memref<8x8xf32, #tpu.memory_space<vmem>>, %arg4: memref<8x8xf32, #tpu.memory_space<vmem>>, %arg5: memref<1x1x8xf32, #tpu.memory_space<vmem>>, %arg6: memref<1x8xf32, #tpu.memory_space<vmem>>) attributes {dimension_semantics = [#tpu.dimension_semantics<parallel>, #tpu.dimension_semantics<arbitrary>], iteration_bounds = array<i64: 2, 1>, scalar_prefetch = 0 : i64, scratch_operands = 1 : i64, tpu.core_type = #tpu.core_type<tc>, window_params = [{transform_indices = @transform_0, window_bounds = array<i64: 1, 512, 8>}, {pipeline_mode = #tpu.pipeline_mode<synchronous>, transform_indices = @transform_1, window_bounds = array<i64: 8, 8>}, {pipeline_mode = #tpu.pipeline_mode<synchronous>, transform_indices = @transform_2, window_bounds = array<i64: 8, 8>}, {transform_indices = @transform_3, window_bounds = array<i64: 1, 1, 8>}]} {
    %c0_i32 = arith.constant 0 : i32
    %0 = arith.cmpi eq, %arg1, %c0_i32 : i32
    %1 = arith.extui %0 : i1 to i32
    %c0_i32_0 = arith.constant 0 : i32
    %2 = arith.cmpi ne, %1, %c0_i32_0 : i32
    scf.if %2 {
      %cst_9 = arith.constant 0.000000e+00 : f32
      %11 = vector.broadcast %cst_9 : f32 to vector<1x8xf32>
      %c0_10 = arith.constant 0 : index
      %c0_11 = arith.constant 0 : index
      %12 = vector.load %arg6[%c0_10, %c0_11] : memref<1x8xf32, #tpu.memory_space<vmem>>, vector<1x8xf32>
      tpu.vector_store %arg6[%c0_10, %c0_11], %11 {strides = array<i32>} : memref<1x8xf32, #tpu.memory_space<vmem>>, vector<1x8xf32>,
    } else {
    }
    %c0 = arith.constant 0 : index
    %c0_1 = arith.constant 0 : index
    %3 = vector.load %arg6[%c0, %c0_1] : memref<1x8xf32, #tpu.memory_space<vmem>>, vector<1x8xf32>
    %c0_2 = arith.constant 0 : index
    %c0_3 = arith.constant 0 : index
    %c0_4 = arith.constant 0 : index
    %4 = vector.load %arg2[%c0_2, %c0_3, %c0_4] : memref<1x512x8xf32, #tpu.memory_space<vmem>>, vector<1x512x8xf32>
    %cst = arith.constant dense<0.000000e+00> : vector<1x8xf32>
    %5 = vector.multi_reduction <add>, %4, %cst [1] : vector<1x512x8xf32> to vector<1x8xf32>
    %6 = arith.addf %3, %5 : vector<1x8xf32>
    %c0_5 = arith.constant 0 : index
    %c0_6 = arith.constant 0 : index
    %7 = vector.load %arg6[%c0_5, %c0_6] : memref<1x8xf32, #tpu.memory_space<vmem>>, vector<1x8xf32>
    tpu.vector_store %arg6[%c0_5, %c0_6], %6 {strides = array<i32>} : memref<1x8xf32, #tpu.memory_space<vmem>>, vector<1x8xf32>,
    %c0_i32_7 = arith.constant 0 : i32
    %8 = arith.cmpi eq, %arg1, %c0_i32_7 : i32
    %9 = arith.extui %8 : i1 to i32
    %c0_i32_8 = arith.constant 0 : i32
    %10 = arith.cmpi ne, %9, %c0_i32_8 : i32
    scf.if %10 {
      %c0_9 = arith.constant 0 : index
      %c0_10 = arith.constant 0 : index
      %11 = vector.load %arg6[%c0_9, %c0_10] : memref<1x8xf32, #tpu.memory_space<vmem>>, vector<1x8xf32>
      %cst_11 = arith.constant 0.001953125 : f32
      %12 = vector.broadcast %cst_11 : f32 to vector<1x8xf32>
      %13 = arith.mulf %11, %12 : vector<1x8xf32>
      %c0_12 = arith.constant 0 : index
      %c0_13 = arith.constant 0 : index
      %14 = vector.load %arg3[%c0_12, %c0_13] : memref<8x8xf32, #tpu.memory_space<vmem>>, vector<8x8xf32>
      %cst_14 = arith.constant dense<0.000000e+00> : vector<1x8xf32>
      %15 = tpu.matmul %13, %14, %cst_14 {dimension_numbers = #tpu.dot_dimension_numbers<[1], [0], [0], [1], [0, 0, 1, 1], [], []>} : vector<1x8xf32>, vector<8x8xf32>, vector<1x8xf32> -> vector<1x8xf32>
      %cst_15 = arith.constant 0.000000e+00 : f32
      %16 = vector.broadcast %cst_15 : f32 to vector<1x8xf32>
      %17 = arith.maximumf %15, %16 : vector<1x8xf32>
      %c0_16 = arith.constant 0 : index
      %c0_17 = arith.constant 0 : index
      %18 = vector.load %arg4[%c0_16, %c0_17] : memref<8x8xf32, #tpu.memory_space<vmem>>, vector<8x8xf32>
      %cst_18 = arith.constant dense<0.000000e+00> : vector<1x8xf32>
      %19 = tpu.matmul %17, %18, %cst_18 {dimension_numbers = #tpu.dot_dimension_numbers<[1], [0], [0], [1], [0, 0, 1, 1], [], []>} : vector<1x8xf32>, vector<8x8xf32>, vector<1x8xf32> -> vector<1x8xf32>
      %20 = arith.negf %19 : vector<1x8xf32>
      %21 = math.exp %20 : vector<1x8xf32>
      %cst_19 = arith.constant 1.000000e+00 : f32
      %22 = vector.broadcast %cst_19 : f32 to vector<1x8xf32>
      %23 = arith.addf %22, %21 : vector<1x8xf32>
      %24 = arith.divf %22, %23 : vector<1x8xf32>
      %c0_20 = arith.constant 0 : index
      %c0_21 = arith.constant 0 : index
      %c0_22 = arith.constant 0 : index
      %25 = vector.load %arg5[%c0_20, %c0_21, %c0_22] : memref<1x1x8xf32, #tpu.memory_space<vmem>>, vector<1x1x8xf32>
      %26 = vector.shape_cast %25 : vector<1x1x8xf32> to vector<1x8xf32>
      %27 = vector.shape_cast %24 : vector<1x8xf32> to vector<1x1x8xf32>
      tpu.vector_store %arg5[%c0_20, %c0_21, %c0_22], %27 {strides = array<i32>} : memref<1x1x8xf32, #tpu.memory_space<vmem>>, vector<1x1x8xf32>,
    } else {
    }
    return
  }
  func.func @transform_0(%arg0: i32, %arg1: i32) -> (i32, i32, i32) {
    %c0_i32 = arith.constant 0 : i32
    %c0_i32_0 = arith.constant 0 : i32
    return %arg0, %arg1, %c0_i32 : i32, i32, i32
  }
  func.func @transform_1(%arg0: i32, %arg1: i32) -> (i32, i32) {
    %c0_i32 = arith.constant 0 : i32
    %c0_i32_0 = arith.constant 0 : i32
    %c0_i32_1 = arith.constant 0 : i32
    return %c0_i32, %c0_i32_0 : i32, i32
  }
  func.func @transform_2(%arg0: i32, %arg1: i32) -> (i32, i32) {
    %c0_i32 = arith.constant 0 : i32
    %c0_i32_0 = arith.constant 0 : i32
    %c0_i32_1 = arith.constant 0 : i32
    return %c0_i32, %c0_i32_0 : i32, i32
  }
  func.func @transform_3(%arg0: i32, %arg1: i32) -> (i32, i32, i32) {
    %c0_i32 = arith.constant 0 : i32
    %c0_i32_0 = arith.constant 0 : i32
    %c0_i32_1 = arith.constant 0 : i32
    return %arg0, %c0_i32, %c0_i32_0 : i32, i32, i32
  }
}

module attributes {stable_mosaic.version = 11 : i64} {
  func.func @_matmul_bias_kernel(%arg0: i32, %arg1: i32, %arg2: i32, %arg3: memref<256x256xbf16, #tpu.memory_space<vmem>>, %arg4: memref<256x128xbf16, #tpu.memory_space<vmem>>, %arg5: memref<1x128xf32, #tpu.memory_space<vmem>>, %arg6: memref<256x128xf32, #tpu.memory_space<vmem>>, %arg7: memref<256x128xf32, #tpu.memory_space<vmem>>) attributes {dimension_semantics = [#tpu.dimension_semantics<parallel>, #tpu.dimension_semantics<parallel>, #tpu.dimension_semantics<arbitrary>], iteration_bounds = array<i64: 4, 1, 1>, scalar_prefetch = 0 : i64, scratch_operands = 1 : i64, tpu.core_type = #tpu.core_type<tc>, window_params = [{transform_indices = @transform_0, window_bounds = array<i64: 256, 256>}, {transform_indices = @transform_1, window_bounds = array<i64: 256, 128>}, {transform_indices = @transform_2, window_bounds = array<i64: 1, 128>}, {transform_indices = @transform_3, window_bounds = array<i64: 256, 128>}]} {
    %c0_i32 = arith.constant 0 : i32
    %0 = arith.cmpi eq, %arg2, %c0_i32 : i32
    %1 = arith.extui %0 : i1 to i32
    %c0_i32_0 = arith.constant 0 : i32
    %2 = arith.cmpi ne, %1, %c0_i32_0 : i32
    scf.if %2 {
      %cst_10 = arith.constant 0.000000e+00 : f32
      %12 = vector.broadcast %cst_10 : f32 to vector<256x128xf32>
      %c0_11 = arith.constant 0 : index
      %c0_12 = arith.constant 0 : index
      %13 = vector.load %arg7[%c0_11, %c0_12] : memref<256x128xf32, #tpu.memory_space<vmem>>, vector<256x128xf32>
      tpu.vector_store %arg7[%c0_11, %c0_12], %12 {strides = array<i32>} : memref<256x128xf32, #tpu.memory_space<vmem>>, vector<256x128xf32>,
    } else {
    }
    %c0 = arith.constant 0 : index
    %c0_1 = arith.constant 0 : index
    %3 = vector.load %arg7[%c0, %c0_1] : memref<256x128xf32, #tpu.memory_space<vmem>>, vector<256x128xf32>
    %c0_2 = arith.constant 0 : index
    %c0_3 = arith.constant 0 : index
    %4 = vector.load %arg3[%c0_2, %c0_3] : memref<256x256xbf16, #tpu.memory_space<vmem>>, vector<256x256xbf16>
    %c0_4 = arith.constant 0 : index
    %c0_5 = arith.constant 0 : index
    %5 = vector.load %arg4[%c0_4, %c0_5] : memref<256x128xbf16, #tpu.memory_space<vmem>>, vector<256x128xbf16>
    %cst = arith.constant dense<0.000000e+00> : vector<256x128xf32>
    %6 = tpu.matmul %4, %5, %cst {dimension_numbers = #tpu.dot_dimension_numbers<[1], [0], [0], [1], [0, 0, 1, 1], [], []>} : vector<256x256xbf16>, vector<256x128xbf16>, vector<256x128xf32> -> vector<256x128xf32>
    %7 = arith.addf %3, %6 : vector<256x128xf32>
    %c0_6 = arith.constant 0 : index
    %c0_7 = arith.constant 0 : index
    %8 = vector.load %arg7[%c0_6, %c0_7] : memref<256x128xf32, #tpu.memory_space<vmem>>, vector<256x128xf32>
    tpu.vector_store %arg7[%c0_6, %c0_7], %7 {strides = array<i32>} : memref<256x128xf32, #tpu.memory_space<vmem>>, vector<256x128xf32>,
    %c0_i32_8 = arith.constant 0 : i32
    %9 = arith.cmpi eq, %arg2, %c0_i32_8 : i32
    %10 = arith.extui %9 : i1 to i32
    %c0_i32_9 = arith.constant 0 : i32
    %11 = arith.cmpi ne, %10, %c0_i32_9 : i32
    scf.if %11 {
      %c0_10 = arith.constant 0 : index
      %c0_11 = arith.constant 0 : index
      %12 = vector.load %arg7[%c0_10, %c0_11] : memref<256x128xf32, #tpu.memory_space<vmem>>, vector<256x128xf32>
      %c0_12 = arith.constant 0 : index
      %c0_13 = arith.constant 0 : index
      %13 = vector.load %arg5[%c0_12, %c0_13] : memref<1x128xf32, #tpu.memory_space<vmem>>, vector<1x128xf32>
      %14 = vector.broadcast %13 : vector<1x128xf32> to vector<256x128xf32>
      %15 = arith.addf %12, %14 : vector<256x128xf32>
      %c0_14 = arith.constant 0 : index
      %c0_15 = arith.constant 0 : index
      %16 = vector.load %arg6[%c0_14, %c0_15] : memref<256x128xf32, #tpu.memory_space<vmem>>, vector<256x128xf32>
      tpu.vector_store %arg6[%c0_14, %c0_15], %15 {strides = array<i32>} : memref<256x128xf32, #tpu.memory_space<vmem>>, vector<256x128xf32>,
    } else {
    }
    return
  }
  func.func @transform_0(%arg0: i32, %arg1: i32, %arg2: i32) -> (i32, i32) {
    %c0_i32 = arith.constant 0 : i32
    return %arg0, %arg2 : i32, i32
  }
  func.func @transform_1(%arg0: i32, %arg1: i32, %arg2: i32) -> (i32, i32) {
    %c0_i32 = arith.constant 0 : i32
    return %arg2, %arg1 : i32, i32
  }
  func.func @transform_2(%arg0: i32, %arg1: i32, %arg2: i32) -> (i32, i32) {
    %c0_i32 = arith.constant 0 : i32
    %c0_i32_0 = arith.constant 0 : i32
    return %c0_i32, %arg1 : i32, i32
  }
  func.func @transform_3(%arg0: i32, %arg1: i32, %arg2: i32) -> (i32, i32) {
    %c0_i32 = arith.constant 0 : i32
    return %arg0, %arg1 : i32, i32
  }
}

</mosaic_0001>

<bundles_post_ra>
// kernel: automerge_forward.4
= control target key start
LH: loop header
LB: loop body
LE: loop exit
PB: predicated region body
PF: predicated region fallthrough
CT: control target
= control target key end

     0   :  { %s567_s9 = smov 0   ;;  %s569_s10 = smov 0   ;;  %s865_s0 = inlined_call_operand.vmem [shape: f32[2,512,8], index: 0, kind: input, shape index: {}]   ;;  %s866_s1 = inlined_call_operand.vmem [shape: f32[2,1,8], index: 1, kind: input, shape index: {}]   ;;  %s867_s2 = inlined_call_operand.vmem [shape: f32[2,512,8], index: 2, kind: output, shape index: {}]  }
   0x1   :  { %s571_s11 = smov 0  }
   0x2 LB: > { %s24_s12 = sadd.s32 1, %s546_s10  ;;  %p494_p0 = scmp.ge.s32.totalorder %s550_s11, 1  ;;  %s550_s11 = sphi %s571_s11, %s12_s11   ;;  %s546_s10 = sphi %s569_s10, %s869_s10   ;;  %s542_s9 = sphi %s567_s9, %s868_s9  }
   0x3   : > { %p26_p1 = scmp.ge.s32.totalorder %s24_s12, 2  ;;  %p141_p2 = scmp.lt.s32.totalorder %s550_s11, 3 }
   0x5   : > { %s871_s12 = smov (%p26_p1, %s24_s12), 0  ;;  %p142_p3 = pnand %p494_p0, %p141_p2 }
   0x6   : > { %p175_p4 = scmp.lt.s32.totalorder (!%p142_p3), %s542_s9, 1 }
   0x7   : > { %145 = sbr.rel (%p142_p3) target bundleno = 82 (0x52), region = 28 }
   0xc   : > { %s873_s9 = smov (!%p175_p4, %s542_s9), 1  ;;  %vm329_vm0 = vcmask 64512  }
   0xd   : > { %s501_s13 = sshll.u32 %s873_s9, 9  ;;  %s186_s16 = scalar_lea.vmem %s866_s1, %s873_s9 }
   0xe   : > { %s591_s19 = scalar_lea.vmem %s865_s0, %s501_s13  ;;  %v593_v0 = vld [vmem:[%s186_s16] ss:$0 sm:$0xff]  ;;  %s598_s22 = scalar_lea.vmem %s867_s2, %s501_s13 }
   0xf   : > { %v197_v1 = vld [vmem:[%s591_s19] sm:$0xff]  ;;  %v198_v2 = vld [vmem:[%s591_s19 + $0x8] sm:$0xff]  ;;  %v199_v3 = vld [vmem:[%s591_s19 + $0x10] sm:$0xff] }
  0x10   : > { %v265_v4 = vmul.f32 %v593_v0, %v197_v1  ;;  %v266_v5 = vmul.f32 %v593_v0, %v198_v2  ;;  %v267_v6 = vmul.f32 %v593_v0, %v199_v3  ;;  %v200_v7 = vld [vmem:[%s591_s19 + $0x18] sm:$0xff]  ;;  %v201_v8 = vld [vmem:[%s591_s19 + $0x20] sm:$0xff]  ;;  %v202_v9 = vld [vmem:[%s591_s19 + $0x28] sm:$0xff] }
  0x11   : > { %v268_v10 = vmul.f32 %v593_v0, %v200_v7  ;;  %v203_v11 = vld [vmem:[%s591_s19 + $0x30] sm:$0xff]  ;;  %v269_v12 = vmul.f32 %v593_v0, %v201_v8  ;;  %v204_v13 = vld [vmem:[%s591_s19 + $0x38] sm:$0xff]  ;;  %v270_v14 = vmul.f32 %v593_v0, %v202_v9  ;;  %v205_v15 = vld [vmem:[%s591_s19 + $0x40] sm:$0xff] }
  0x12   : > { %330 = vst.msk [vmem:[%s598_s22] sm:$0xff] %vm329_vm0, %v265_v4  ;;  %v271_v16 = vmul.f32 %v593_v0, %v203_v11  ;;  %v206_v17 = vld [vmem:[%s591_s19 + $0x48] sm:$0xff]  ;;  %v272_v18 = vmul.f32 %v593_v0, %v204_v13  ;;  %v207_v19 = vld [vmem:[%s591_s19 + $0x50] sm:$0xff]  ;;  %v273_v20 = vmul.f32 %v593_v0, %v205_v15  ;;  %v208_v21 = vld [vmem:[%s591_s19 + $0x58] sm:$0xff] }
  0x13   : > { %331 = vst.msk [vmem:[%s598_s22 + $0x8] sm:$0xff] %vm329_vm0, %v266_v5  ;;  %v274_v22 = vmul.f32 %v593_v0, %v206_v17  ;;  %v209_v23 = vld [vmem:[%s591_s19 + $0x60] sm:$0xff]  ;;  %v275_v24 = vmul.f32 %v593_v0, %v207_v19  ;;  %v210_v25 = vld [vmem:[%s591_s19 + $0x68] sm:$0xff]  ;;  %v276_v26 = vmul.f32 %v593_v0, %v208_v21  ;;  %v211_v27 = vld [vmem:[%s591_s19 + $0x70] sm:$0xff] }
  0x14   : > { %332 = vst.msk [vmem:[%s598_s22 + $0x10] sm:$0xff] %vm329_vm0, %v267_v6  ;;  %v277_v28 = vmul.f32 %v593_v0, %v209_v23  ;;  %v212_v29 = vld [vmem:[%s591_s19 + $0x78] sm:$0xff]  ;;  %v278_v30 = vmul.f32 %v593_v0, %v210_v25  ;;  %v213_v31 = vld [vmem:[%s591_s19 + $0x80] sm:$0xff]  ;;  %v279_v32 = vmul.f32 %v593_v0, %v211_v27  ;;  %v214_v33 = vld [vmem:[%s591_s19 + $0x88] sm:$0xff] }
  0x15   : > { %333 = vst.msk [vmem:[%s598_s22 + $0x18] sm:$0xff] %vm329_vm0, %v268_v10  ;;  %v280_v34 = vmul.f32 %v593_v0, %v212_v29  ;;  %v215_v35 = vld [vmem:[%s591_s19 + $0x90] sm:$0xff]  ;;  %v281_v36 = vmul.f32 %v593_v0, %v213_v31  ;;  %v216_v37 = vld [vmem:[%s591_s19 + $0x98] sm:$0xff]  ;;  %v282_v38 = vmul.f32 %v593_v0, %v214_v33  ;;  %v217_v39 = vld [vmem:[%s591_s19 + $0xa0] sm:$0xff] }
  0x16   : > { %334 = vst.msk [vmem:[%s598_s22 + $0x20] sm:$0xff] %vm329_vm0, %v269_v12  ;;  %v283_v40 = vmul.f32 %v593_v0, %v215_v35  ;;  %v218_v41 = vld [vmem:[%s591_s19 + $0xa8] sm:$0xff]  ;;  %v284_v42 = vmul.f32 %v593_v0, %v216_v37  ;;  %v219_v43 = vld [vmem:[%s591_s19 + $0xb0] sm:$0xff]  ;;  %v285_v44 = vmul.f32 %v593_v0, %v217_v39  ;;  %v220_v45 = vld [vmem:[%s591_s19 + $0xb8] sm:$0xff] }
  0x17   : > { %335 = vst.msk [vmem:[%s598_s22 + $0x28] sm:$0xff] %vm329_vm0, %v270_v14  ;;  %v286_v46 = vmul.f32 %v593_v0, %v218_v41  ;;  %v221_v47 = vld [vmem:[%s591_s19 + $0xc0] sm:$0xff]  ;;  %v287_v48 = vmul.f32 %v593_v0, %v219_v43  ;;  %v222_v49 = vld [vmem:[%s591_s19 + $0xc8] sm:$0xff]  ;;  %v288_v50 = vmul.f32 %v593_v0, %v220_v45  ;;  %v223_v51 = vld [vmem:[%s591_s19 + $0xd0] sm:$0xff] }
  0x18   : > { %336 = vst.msk [vmem:[%s598_s22 + $0x30] sm:$0xff] %vm329_vm0, %v271_v16  ;;  %v289_v52 = vmul.f32 %v593_v0, %v221_v47  ;;  %v224_v53 = vld [vmem:[%s591_s19 + $0xd8] sm:$0xff]  ;;  %v290_v54 = vmul.f32 %v593_v0, %v222_v49  ;;  %v225_v55 = vld [vmem:[%s591_s19 + $0xe0] sm:$0xff]  ;;  %v291_v56 = vmul.f32 %v593_v0, %v223_v51  ;;  %v226_v57 = vld [vmem:[%s591_s19 + $0xe8] sm:$0xff] }
  0x19   : > { %337 = vst.msk [vmem:[%s598_s22 + $0x38] sm:$0xff] %vm329_vm0, %v272_v18  ;;  %v292_v58 = vmul.f32 %v593_v0, %v224_v53  ;;  %v227_v59 = vld [vmem:[%s591_s19 + $0xf0] sm:$0xff]  ;;  %v293_v60 = vmul.f32 %v593_v0, %v225_v55  ;;  %v228_v61 = vld [vmem:[%s591_s19 + $0xf8] sm:$0xff]  ;;  %v294_v62 = vmul.f32 %v593_v0, %v226_v57  ;;  %v229_v63 = vld [vmem:[%s591_s19 + $0x100] sm:$0xff] }
  0x1a   : > { %338 = vst.msk [vmem:[%s598_s22 + $0x40] sm:$0xff] %vm329_vm0, %v273_v20  ;;  %v295_v1 = vmul.f32 %v593_v0, %v227_v59  ;;  %v230_v2 = vld [vmem:[%s591_s19 + $0x108] sm:$0xff]  ;;  %v296_v3 = vmul.f32 %v593_v0, %v228_v61  ;;  %v231_v4 = vld [vmem:[%s591_s19 + $0x110] sm:$0xff]  ;;  %v297_v5 = vmul.f32 %v593_v0, %v229_v63  ;;  %v232_v6 = vld [vmem:[%s591_s19 + $0x118] sm:$0xff] }
  0x1b   : > { %339 = vst.msk [vmem:[%s598_s22 + $0x48] sm:$0xff] %vm329_vm0, %v274_v22  ;;  %v298_v7 = vmul.f32 %v593_v0, %v230_v2  ;;  %v233_v8 = vld [vmem:[%s591_s19 + $0x120] sm:$0xff]  ;;  %v299_v9 = vmul.f32 %v593_v0, %v231_v4  ;;  %v234_v10 = vld [vmem:[%s591_s19 + $0x128] sm:$0xff]  ;;  %v300_v11 = vmul.f32 %v593_v0, %v232_v6  ;;  %v235_v12 = vld [vmem:[%s591_s19 + $0x130] sm:$0xff] }
  0x1c   : > { %340 = vst.msk [vmem:[%s598_s22 + $0x50] sm:$0xff] %vm329_vm0, %v275_v24  ;;  %v301_v13 = vmul.f32 %v593_v0, %v233_v8  ;;  %v236_v14 = vld [vmem:[%s591_s19 + $0x138] sm:$0xff]  ;;  %v302_v15 = vmul.f32 %v593_v0, %v234_v10  ;;  %v237_v16 = vld [vmem:[%s591_s19 + $0x140] sm:$0xff]  ;;  %v303_v17 = vmul.f32 %v593_v0, %v235_v12  ;;  %v238_v18 = vld [vmem:[%s591_s19 + $0x148] sm:$0xff] }
  0x1d   : > { %341 = vst.msk [vmem:[%s598_s22 + $0x58] sm:$0xff] %vm329_vm0, %v276_v26  ;;  %v304_v19 = vmul.f32 %v593_v0, %v236_v14  ;;  %v239_v20 = vld [vmem:[%s591_s19 + $0x150] sm:$0xff]  ;;  %v305_v21 = vmul.f32 %v593_v0, %v237_v16  ;;  %v240_v22 = vld [vmem:[%s591_s19 + $0x158] sm:$0xff]  ;;  %v306_v23 = vmul.f32 %v593_v0, %v238_v18  ;;  %v241_v24 = vld [vmem:[%s591_s19 + $0x160] sm:$0xff] }
  0x1e   : > { %342 = vst.msk [vmem:[%s598_s22 + $0x60] sm:$0xff] %vm329_vm0, %v277_v28  ;;  %v307_v25 = vmul.f32 %v593_v0, %v239_v20  ;;  %v242_v26 = vld [vmem:[%s591_s19 + $0x168] sm:$0xff]  ;;  %v308_v27 = vmul.f32 %v593_v0, %v240_v22  ;;  %v243_v28 = vld [vmem:[%s591_s19 + $0x170] sm:$0xff]  ;;  %v309_v29 = vmul.f32 %v593_v0, %v241_v24 }
  0x1f   : > { %343 = vst.msk [vmem:[%s598_s22 + $0x68] sm:$0xff] %vm329_vm0, %v278_v30  ;;  %v244_v30 = vld [vmem:[%s591_s19 + $0x178] sm:$0xff]  ;;  %v310_v31 = vmul.f32 %v593_v0, %v242_v26  ;;  %v311_v33 = vmul.f32 %v593_v0, %v243_v28 }
  0x20   : > { %344 = vst.msk [vmem:[%s598_s22 + $0x70] sm:$0xff] %vm329_vm0, %v279_v32  ;;  %v245_v32 = vld [vmem:[%s591_s19 + $0x180] sm:$0xff]  ;;  %v312_v35 = vmul.f32 %v593_v0, %v244_v30 }
  0x21   : > { %345 = vst.msk [vmem:[%s598_s22 + $0x78] sm:$0xff] %vm329_vm0, %v280_v34  ;;  %v246_v34 = vld [vmem:[%s591_s19 + $0x188] sm:$0xff]  ;;  %v313_v37 = vmul.f32 %v593_v0, %v245_v32 }
  0x22   : > { %346 = vst.msk [vmem:[%s598_s22 + $0x80] sm:$0xff] %vm329_vm0, %v281_v36  ;;  %v247_v36 = vld [vmem:[%s591_s19 + $0x190] sm:$0xff]  ;;  %v314_v39 = vmul.f32 %v593_v0, %v246_v34 }
  0x23   : > { %347 = vst.msk [vmem:[%s598_s22 + $0x88] sm:$0xff] %vm329_vm0, %v282_v38  ;;  %v248_v38 = vld [vmem:[%s591_s19 + $0x198] sm:$0xff]  ;;  %v315_v41 = vmul.f32 %v593_v0, %v247_v36 }
  0x24   : > { %348 = vst.msk [vmem:[%s598_s22 + $0x90] sm:$0xff] %vm329_vm0, %v283_v40  ;;  %v249_v40 = vld [vmem:[%s591_s19 + $0x1a0] sm:$0xff]  ;;  %v316_v43 = vmul.f32 %v593_v0, %v248_v38 }
  0x25   : > { %349 = vst.msk [vmem:[%s598_s22 + $0x98] sm:$0xff] %vm329_vm0, %v284_v42  ;;  %v250_v42 = vld [vmem:[%s591_s19 + $0x1a8] sm:$0xff]  ;;  %v317_v45 = vmul.f32 %v593_v0, %v249_v40 }
  0x26   : > { %350 = vst.msk [vmem:[%s598_s22 + $0xa0] sm:$0xff] %vm329_vm0, %v285_v44  ;;  %v251_v44 = vld [vmem:[%s591_s19 + $0x1b0] sm:$0xff]  ;;  %v318_v47 = vmul.f32 %v593_v0, %v250_v42 }
  0x27   : > { %351 = vst.msk [vmem:[%s598_s22 + $0xa8] sm:$0xff] %vm329_vm0, %v286_v46  ;;  %v252_v46 = vld [vmem:[%s591_s19 + $0x1b8] sm:$0xff]  ;;  %v319_v49 = vmul.f32 %v593_v0, %v251_v44 }
  0x28   : > { %352 = vst.msk [vmem:[%s598_s22 + $0xb0] sm:$0xff] %vm329_vm0, %v287_v48  ;;  %v253_v48 = vld [vmem:[%s591_s19 + $0x1c0] sm:$0xff]  ;;  %v320_v51 = vmul.f32 %v593_v0, %v252_v46 }
  0x29   : > { %353 = vst.msk [vmem:[%s598_s22 + $0xb8] sm:$0xff] %vm329_vm0, %v288_v50  ;;  %v254_v50 = vld [vmem:[%s591_s19 + $0x1c8] sm:$0xff]  ;;  %v321_v53 = vmul.f32 %v593_v0, %v253_v48 }
  0x2a   : > { %354 = vst.msk [vmem:[%s598_s22 + $0xc0] sm:$0xff] %vm329_vm0, %v289_v52  ;;  %v255_v52 = vld [vmem:[%s591_s19 + $0x1d0] sm:$0xff]  ;;  %v322_v55 = vmul.f32 %v593_v0, %v254_v50 }
  0x2b   : > { %355 = vst.msk [vmem:[%s598_s22 + $0xc8] sm:$0xff] %vm329_vm0, %v290_v54  ;;  %v256_v54 = vld [vmem:[%s591_s19 + $0x1d8] sm:$0xff]  ;;  %v323_v57 = vmul.f32 %v593_v0, %v255_v52 }
  0x2c   : > { %356 = vst.msk [vmem:[%s598_s22 + $0xd0] sm:$0xff] %vm329_vm0, %v291_v56  ;;  %v257_v56 = vld [vmem:[%s591_s19 + $0x1e0] sm:$0xff]  ;;  %v324_v59 = vmul.f32 %v593_v0, %v256_v54 }
  0x2d   : > { %357 = vst.msk [vmem:[%s598_s22 + $0xd8] sm:$0xff] %vm329_vm0, %v292_v58  ;;  %v258_v58 = vld [vmem:[%s591_s19 + $0x1e8] sm:$0xff]  ;;  %v325_v61 = vmul.f32 %v593_v0, %v257_v56 }
  0x2e   : > { %358 = vst.msk [vmem:[%s598_s22 + $0xe0] sm:$0xff] %vm329_vm0, %v293_v60  ;;  %v259_v60 = vld [vmem:[%s591_s19 + $0x1f0] sm:$0xff]  ;;  %v326_v63 = vmul.f32 %v593_v0, %v258_v58 }
  0x2f   : > { %359 = vst.msk [vmem:[%s598_s22 + $0xe8] sm:$0xff] %vm329_vm0, %v294_v62  ;;  %v260_v62 = vld [vmem:[%s591_s19 + $0x1f8] sm:$0xff] }
  0x30   : > { %360 = vst.msk [vmem:[%s598_s22 + $0xf0] sm:$0xff] %vm329_vm0, %v295_v1  ;;  %v327_v1 = vmul.f32 %v593_v0, %v259_v60  ;;  %v328_v2 = vmul.f32 %v593_v0, %v260_v62 }
  0x31   : > { %361 = vst.msk [vmem:[%s598_s22 + $0xf8] sm:$0xff] %vm329_vm0, %v296_v3 }
  0x32   : > { %362 = vst.msk [vmem:[%s598_s22 + $0x100] sm:$0xff] %vm329_vm0, %v297_v5 }
  0x33   : > { %363 = vst.msk [vmem:[%s598_s22 + $0x108] sm:$0xff] %vm329_vm0, %v298_v7 }
  0x34   : > { %364 = vst.msk [vmem:[%s598_s22 + $0x110] sm:$0xff] %vm329_vm0, %v299_v9 }
  0x35   : > { %365 = vst.msk [vmem:[%s598_s22 + $0x118] sm:$0xff] %vm329_vm0, %v300_v11 }
  0x36   : > { %366 = vst.msk [vmem:[%s598_s22 + $0x120] sm:$0xff] %vm329_vm0, %v301_v13 }
  0x37   : > { %367 = vst.msk [vmem:[%s598_s22 + $0x128] sm:$0xff] %vm329_vm0, %v302_v15 }
  0x38   : > { %368 = vst.msk [vmem:[%s598_s22 + $0x130] sm:$0xff] %vm329_vm0, %v303_v17 }
  0x39   : > { %369 = vst.msk [vmem:[%s598_s22 + $0x138] sm:$0xff] %vm329_vm0, %v304_v19 }
  0x3a   : > { %370 = vst.msk [vmem:[%s598_s22 + $0x140] sm:$0xff] %vm329_vm0, %v305_v21 }
  0x3b   : > { %371 = vst.msk [vmem:[%s598_s22 + $0x148] sm:$0xff] %vm329_vm0, %v306_v23 }
  0x3c   : > { %372 = vst.msk [vmem:[%s598_s22 + $0x150] sm:$0xff] %vm329_vm0, %v307_v25 }
  0x3d   : > { %373 = vst.msk [vmem:[%s598_s22 + $0x158] sm:$0xff] %vm329_vm0, %v308_v27 }
  0x3e   : > { %374 = vst.msk [vmem:[%s598_s22 + $0x160] sm:$0xff] %vm329_vm0, %v309_v29 }
  0x3f   : > { %375 = vst.msk [vmem:[%s598_s22 + $0x168] sm:$0xff] %vm329_vm0, %v310_v31 }
  0x40   : > { %376 = vst.msk [vmem:[%s598_s22 + $0x170] sm:$0xff] %vm329_vm0, %v311_v33 }
  0x41   : > { %377 = vst.msk [vmem:[%s598_s22 + $0x178] sm:$0xff] %vm329_vm0, %v312_v35 }
  0x42   : > { %378 = vst.msk [vmem:[%s598_s22 + $0x180] sm:$0xff] %vm329_vm0, %v313_v37 }
  0x43   : > { %379 = vst.msk [vmem:[%s598_s22 + $0x188] sm:$0xff] %vm329_vm0, %v314_v39 }
  0x44   : > { %380 = vst.msk [vmem:[%s598_s22 + $0x190] sm:$0xff] %vm329_vm0, %v315_v41 }
  0x45   : > { %381 = vst.msk [vmem:[%s598_s22 + $0x198] sm:$0xff] %vm329_vm0, %v316_v43 }
  0x46   : > { %382 = vst.msk [vmem:[%s598_s22 + $0x1a0] sm:$0xff] %vm329_vm0, %v317_v45 }
  0x47   : > { %383 = vst.msk [vmem:[%s598_s22 + $0x1a8] sm:$0xff] %vm329_vm0, %v318_v47 }
  0x48   : > { %384 = vst.msk [vmem:[%s598_s22 + $0x1b0] sm:$0xff] %vm329_vm0, %v319_v49 }
  0x49   : > { %385 = vst.msk [vmem:[%s598_s22 + $0x1b8] sm:$0xff] %vm329_vm0, %v320_v51 }
  0x4a   : > { %386 = vst.msk [vmem:[%s598_s22 + $0x1c0] sm:$0xff] %vm329_vm0, %v321_v53 }
  0x4b   : > { %387 = vst.msk [vmem:[%s598_s22 + $0x1c8] sm:$0xff] %vm329_vm0, %v322_v55 }
  0x4c   : > { %388 = vst.msk [vmem:[%s598_s22 + $0x1d0] sm:$0xff] %vm329_vm0, %v323_v57 }
  0x4d   : > { %389 = vst.msk [vmem:[%s598_s22 + $0x1d8] sm:$0xff] %vm329_vm0, %v324_v59 }
  0x4e   : > { %390 = vst.msk [vmem:[%s598_s22 + $0x1e0] sm:$0xff] %vm329_vm0, %v325_v61 }
  0x4f   : > { %391 = vst.msk [vmem:[%s598_s22 + $0x1e8] sm:$0xff] %vm329_vm0, %v326_v63 }
  0x50   : > { %392 = vst.msk [vmem:[%s598_s22 + $0x1f0] sm:$0xff] %vm329_vm0, %v327_v1 }
  0x51   : > { %393 = vst.msk [vmem:[%s598_s22 + $0x1f8] sm:$0xff] %vm329_vm0, %v328_v2 }
  0x52 PF: > { %s12_s11 = sadd.s32 1, %s550_s11   ;;  %s868_s9 = smov %s546_s10 }
  0x53   : > { %p9_p5 = scmp.ge.s32.totalorder %s12_s11, 4   ;;  %s869_s10 = smov %s871_s12 }
  0x55   :  { %11 = sbr.rel (!%p9_p5) target bundleno = 2 (0x2), region = 61 }

// kernel: automerge_forward.3
= control target key start
LH: loop header
LB: loop body
LE: loop exit
PB: predicated region body
PF: predicated region fallthrough
CT: control target
= control target key end

     0   :  { %8 = vsyncpa [#allocation4], 0  ;;  %s978_s0 = inlined_call_operand.vmem [shape: f32[2,512,8], index: 0, kind: input, shape index: {}]   ;;  %s979_s1 = inlined_call_operand.hbm [shape: f32[8,8], index: 1, kind: input, shape index: {}]   ;;  %s980_s2 = inlined_call_operand.hbm [shape: f32[8,8], index: 2, kind: input, shape index: {}]   ;;  %s981_s3 = inlined_call_operand.vmem [shape: f32[2,1,8], index: 3, kind: output, shape index: {}]  }
   0x1   :  { %9 = vsyncpa [#allocation6], 0  ;;  %s773_s12 = smov 0   ;;  %s775_s13 = smov 0  }
   0x2   :  { %s777_s14 = smov 0  }
   0x3 LB: > { %s591_s15 = sadd.s32 4294967295, %s748_s14   ;;  %s27_s16 = sadd.s32 1, %s744_s13  ;;  %s748_s14 = sphi %s777_s14, %s15_s14   ;;  %s744_s13 = sphi %s775_s13, %s985_s13   ;;  %s740_s12 = sphi %s773_s12, %s984_s12  }
   0x4   : > { %p29_p0 = scmp.ge.s32.totalorder %s27_s16, 2  ;;  %p593_p1 = scmp.ge.s32.totalorder %s748_s14, 1 }
   0x5   : > { %p128_p2 = scmp.lt.s32.totalorder %s748_s14, 3  ;;  %p798_p4 = scmp.eq.s32.totalorder %s591_s15, 0 }
   0x6   : > { %s987_s16 = smov (%p29_p0, %s27_s16), 0  ;;  %s140_s21 = sshll.u32 %s979_s1, 4  ;;  %s141_s21 = int_to_ptr.hbm [resolvable:$true] %s140_s21 }
   0x7   : > { %p794_p3 = pnand %p593_p1, %p128_p2  ;;  %s750_s22 = smov [#allocation3]  }
   0x8   : > { %s142_s23 = sshll.u32 %s750_s22, 4  ;;  %s152_s26 = sshll.u32 %s980_s2, 4  ;;  %s143_s23 = int_to_ptr.vmem [resolvable:$true] %s142_s23  ;;  %s153_s26 = int_to_ptr.hbm [resolvable:$true] %s152_s26 }
   0x9   : > { %p616_p5 = pneg %p794_p3  ;;  %s751_s27 = smov [#allocation5]  }
   0xa   : > { %s154_s28 = sshll.u32 %s751_s27, 4  ;;  %180 = sbr.rel (%p794_p3) target bundleno = 458 (0x1ca), region = 32  ;;  %s155_s28 = int_to_ptr.vmem [resolvable:$true] %s154_s28 }
   0xb   : > { %p617_p6 = pnand %p798_p4, %p616_p5 }
   0xd   : > { %619 = dma.hbm_to_vmem [thread:$0]  (!%p617_p6), %s141_s21, 128, %s143_s23, [#allocation4]  }
   0xe   : > { %622 = dma.hbm_to_vmem [thread:$0]  (!%p617_p6), %s153_s26, 128, %s155_s28, [#allocation6]  }
   0xf   : > { %731 = dma.done.wait (%p798_p4), [#allocation4], 128  }
  0x10   : > { %733 = vsyncadd (%p798_p4), [#allocation4], 4294967168 }
  0x11   : > { %735 = dma.done.wait (%p798_p4), [#allocation6], 128  }
  0x12   : > { %737 = vsyncadd (%p798_p4), [#allocation6], 4294967168  ;;  %p213_p7 = scmp.lt.s32.totalorder %s740_s12, 1  ;;  %vm229_vm0 = vcmask 57344   ;;  %v752_v0 = vmov 0.0   ;;  %vm296_vm1 = vcmask 64512  }
  0x13   : > { %230 = vst.msk [vmem:[#allocation2] sm:$0x1] %vm229_vm0, %v752_v0  ;;  %v438_v1 = vld [vmem:[#allocation3] sm:$0xff] }
  0x14   : > { %s989_s12 = smov (!%p213_p7, %s740_s12), 1  ;;  %457 = vmatpush.msra.mxu0 %v438_v1 }
  0x15   : > { %s607_s29 = sshll.u32 %s989_s12, 9  ;;  %s224_s8 = scalar_lea.vmem %s981_s3, %s989_s12 }
  0x16   : > { %s831_s5 = scalar_lea.vmem %s978_s0, %s607_s29 }
  0x17   : > { %v232_v2 = vld [vmem:[%s831_s5] sm:$0xff]  ;;  %v233_v3 = vld [vmem:[%s831_s5 + $0x8] sm:$0xff]  ;;  %v234_v4 = vld [vmem:[%s831_s5 + $0x10] sm:$0xff] }
  0x18   : > { %v235_v5 = vld [vmem:[%s831_s5 + $0x18] sm:$0xff]  ;;  %v297_v6 = vsel %vm296_vm1, %v232_v2, 0.0  ;;  %v298_v7 = vsel %vm296_vm1, %v233_v3, 0.0  ;;  %v236_v8 = vld [vmem:[%s831_s5 + $0x20] sm:$0xff]  ;;  %v300_v10 = vsel %vm296_vm1, %v234_v4, 0.0  ;;  %v237_v12 = vld [vmem:[%s831_s5 + $0x28] sm:$0xff] }
  0x19   : > { %v299_v9 = vadd.f32 %v298_v7, %v297_v6  ;;  %v302_v11 = vsel %vm296_vm1, %v235_v5, 0.0  ;;  %v304_v14 = vsel %vm296_vm1, %v236_v8, 0.0  ;;  %v238_v15 = vld [vmem:[%s831_s5 + $0x30] sm:$0xff]  ;;  %v306_v17 = vsel %vm296_vm1, %v237_v12, 0.0  ;;  %v239_v18 = vld [vmem:[%s831_s5 + $0x38] sm:$0xff]  ;;  %v240_v21 = vld [vmem:[%s831_s5 + $0x40] sm:$0xff] }
  0x1a   : > { %v308_v20 = vsel %vm296_vm1, %v238_v15, 0.0  ;;  %v310_v23 = vsel %vm296_vm1, %v239_v18, 0.0  ;;  %v241_v24 = vld [vmem:[%s831_s5 + $0x48] sm:$0xff]  ;;  %v312_v26 = vsel %vm296_vm1, %v240_v21, 0.0  ;;  %v242_v27 = vld [vmem:[%s831_s5 + $0x50] sm:$0xff]  ;;  %v243_v30 = vld [vmem:[%s831_s5 + $0x58] sm:$0xff] }
  0x1b   : > { %v301_v13 = vadd.f32 %v300_v10, %v299_v9  ;;  %v314_v29 = vsel %vm296_vm1, %v241_v24, 0.0  ;;  %v316_v32 = vsel %vm296_vm1, %v242_v27, 0.0  ;;  %v244_v33 = vld [vmem:[%s831_s5 + $0x60] sm:$0xff]  ;;  %v318_v35 = vsel %vm296_vm1, %v243_v30, 0.0  ;;  %v245_v36 = vld [vmem:[%s831_s5 + $0x68] sm:$0xff]  ;;  %v246_v39 = vld [vmem:[%s831_s5 + $0x70] sm:$0xff] }
  0x1c   : > { %v320_v38 = vsel %vm296_vm1, %v244_v33, 0.0  ;;  %v322_v41 = vsel %vm296_vm1, %v245_v36, 0.0  ;;  %v247_v42 = vld [vmem:[%s831_s5 + $0x78] sm:$0xff]  ;;  %v324_v44 = vsel %vm296_vm1, %v246_v39, 0.0  ;;  %v248_v45 = vld [vmem:[%s831_s5 + $0x80] sm:$0xff]  ;;  %v249_v48 = vld [vmem:[%s831_s5 + $0x88] sm:$0xff] }
  0x1d   : > { %v303_v16 = vadd.f32 %v302_v11, %v301_v13  ;;  %v326_v47 = vsel %vm296_vm1, %v247_v42, 0.0  ;;  %v328_v50 = vsel %vm296_vm1, %v248_v45, 0.0  ;;  %v250_v51 = vld [vmem:[%s831_s5 + $0x90] sm:$0xff]  ;;  %v330_v53 = vsel %vm296_vm1, %v249_v48, 0.0  ;;  %v251_v54 = vld [vmem:[%s831_s5 + $0x98] sm:$0xff]  ;;  %v252_v57 = vld [vmem:[%s831_s5 + $0xa0] sm:$0xff] }
  0x1e   : > { %v332_v56 = vsel %vm296_vm1, %v250_v51, 0.0  ;;  %v334_v59 = vsel %vm296_vm1, %v251_v54, 0.0  ;;  %v253_v60 = vld [vmem:[%s831_s5 + $0xa8] sm:$0xff]  ;;  %v336_v62 = vsel %vm296_vm1, %v252_v57, 0.0  ;;  %v254_v63 = vld [vmem:[%s831_s5 + $0xb0] sm:$0xff]  ;;  %v255_v2 = vld [vmem:[%s831_s5 + $0xb8] sm:$0xff] }
  0x1f   : > { %v305_v19 = vadd.f32 %v304_v14, %v303_v16  ;;  %v338_v1 = vsel %vm296_vm1, %v253_v60, 0.0  ;;  %v340_v4 = vsel %vm296_vm1, %v254_v63, 0.0  ;;  %v256_v5 = vld [vmem:[%s831_s5 + $0xc0] sm:$0xff]  ;;  %v342_v7 = vsel %vm296_vm1, %v255_v2, 0.0  ;;  %v257_v8 = vld [vmem:[%s831_s5 + $0xc8] sm:$0xff]  ;;  %v258_v11 = vld [vmem:[%s831_s5 + $0xd0] sm:$0xff] }
  0x20   : > { %v344_v10 = vsel %vm296_vm1, %v256_v5, 0.0  ;;  %v346_v13 = vsel %vm296_vm1, %v257_v8, 0.0  ;;  %v259_v14 = vld [vmem:[%s831_s5 + $0xd8] sm:$0xff]  ;;  %v348_v16 = vsel %vm296_vm1, %v258_v11, 0.0 }
  0x21   : > { %v307_v22 = vadd.f32 %v306_v17, %v305_v19  ;;  %v260_v17 = vld [vmem:[%s831_s5 + $0xe0] sm:$0xff]  ;;  %v350_v19 = vsel %vm296_vm1, %v259_v14, 0.0 }
  0x23   : > { %v309_v25 = vadd.f32 %v308_v20, %v307_v22  ;;  %v261_v20 = vld [vmem:[%s831_s5 + $0xe8] sm:$0xff]  ;;  %v352_v22 = vsel %vm296_vm1, %v260_v17, 0.0 }
  0x25   : > { %v311_v28 = vadd.f32 %v310_v23, %v309_v25  ;;  %v262_v23 = vld [vmem:[%s831_s5 + $0xf0] sm:$0xff]  ;;  %v354_v25 = vsel %vm296_vm1, %v261_v20, 0.0 }
  0x27   : > { %v313_v31 = vadd.f32 %v312_v26, %v311_v28  ;;  %v263_v26 = vld [vmem:[%s831_s5 + $0xf8] sm:$0xff]  ;;  %v356_v28 = vsel %vm296_vm1, %v262_v23, 0.0 }
  0x29   : > { %v315_v34 = vadd.f32 %v314_v29, %v313_v31  ;;  %v264_v29 = vld [vmem:[%s831_s5 + $0x100] sm:$0xff]  ;;  %v358_v31 = vsel %vm296_vm1, %v263_v26, 0.0 }
  0x2b   : > { %v317_v37 = vadd.f32 %v316_v32, %v315_v34  ;;  %v265_v32 = vld [vmem:[%s831_s5 + $0x108] sm:$0xff]  ;;  %v360_v34 = vsel %vm296_vm1, %v264_v29, 0.0 }
  0x2d   : > { %v319_v40 = vadd.f32 %v318_v35, %v317_v37  ;;  %v266_v35 = vld [vmem:[%s831_s5 + $0x110] sm:$0xff]  ;;  %v362_v37 = vsel %vm296_vm1, %v265_v32, 0.0 }
  0x2f   : > { %v321_v43 = vadd.f32 %v320_v38, %v319_v40  ;;  %v267_v38 = vld [vmem:[%s831_s5 + $0x118] sm:$0xff]  ;;  %v364_v40 = vsel %vm296_vm1, %v266_v35, 0.0 }
  0x31   : > { %v323_v46 = vadd.f32 %v322_v41, %v321_v43  ;;  %v268_v41 = vld [vmem:[%s831_s5 + $0x120] sm:$0xff]  ;;  %v366_v43 = vsel %vm296_vm1, %v267_v38, 0.0 }
  0x33   : > { %v325_v49 = vadd.f32 %v324_v44, %v323_v46  ;;  %v269_v44 = vld [vmem:[%s831_s5 + $0x128] sm:$0xff]  ;;  %v368_v46 = vsel %vm296_vm1, %v268_v41, 0.0 }
  0x35   : > { %v327_v52 = vadd.f32 %v326_v47, %v325_v49  ;;  %v270_v47 = vld [vmem:[%s831_s5 + $0x130] sm:$0xff]  ;;  %v370_v49 = vsel %vm296_vm1, %v269_v44, 0.0 }
  0x37   : > { %v329_v55 = vadd.f32 %v328_v50, %v327_v52  ;;  %v271_v50 = vld [vmem:[%s831_s5 + $0x138] sm:$0xff]  ;;  %v372_v52 = vsel %vm296_vm1, %v270_v47, 0.0 }
  0x39   : > { %v331_v58 = vadd.f32 %v330_v53, %v329_v55  ;;  %v272_v53 = vld [vmem:[%s831_s5 + $0x140] sm:$0xff]  ;;  %v374_v55 = vsel %vm296_vm1, %v271_v50, 0.0 }
  0x3b   : > { %v333_v61 = vadd.f32 %v332_v56, %v331_v58  ;;  %v273_v56 = vld [vmem:[%s831_s5 + $0x148] sm:$0xff]  ;;  %v376_v58 = vsel %vm296_vm1, %v272_v53, 0.0 }
  0x3d   : > { %v335_v0 = vadd.f32 %v334_v59, %v333_v61  ;;  %v274_v59 = vld [vmem:[%s831_s5 + $0x150] sm:$0xff]  ;;  %v378_v61 = vsel %vm296_vm1, %v273_v56, 0.0 }
  0x3f   : > { %v337_v3 = vadd.f32 %v336_v62, %v335_v0  ;;  %v275_v62 = vld [vmem:[%s831_s5 + $0x158] sm:$0xff]  ;;  %v380_v0 = vsel %vm296_vm1, %v274_v59, 0.0 }
  0x41   : > { %v339_v6 = vadd.f32 %v338_v1, %v337_v3  ;;  %v276_v1 = vld [vmem:[%s831_s5 + $0x160] sm:$0xff]  ;;  %v382_v3 = vsel %vm296_vm1, %v275_v62, 0.0 }
  0x43   : > { %v341_v9 = vadd.f32 %v340_v4, %v339_v6  ;;  %v277_v4 = vld [vmem:[%s831_s5 + $0x168] sm:$0xff]  ;;  %v384_v6 = vsel %vm296_vm1, %v276_v1, 0.0 }
  0x45   : > { %v343_v12 = vadd.f32 %v342_v7, %v341_v9  ;;  %v278_v7 = vld [vmem:[%s831_s5 + $0x170] sm:$0xff]  ;;  %v386_v9 = vsel %vm296_vm1, %v277_v4, 0.0 }
  0x47   : > { %v345_v15 = vadd.f32 %v344_v10, %v343_v12  ;;  %v279_v10 = vld [vmem:[%s831_s5 + $0x178] sm:$0xff]  ;;  %v388_v12 = vsel %vm296_vm1, %v278_v7, 0.0 }
  0x49   : > { %v347_v18 = vadd.f32 %v346_v13, %v345_v15  ;;  %v280_v13 = vld [vmem:[%s831_s5 + $0x180] sm:$0xff]  ;;  %v390_v15 = vsel %vm296_vm1, %v279_v10, 0.0 }
  0x4b   : > { %v349_v21 = vadd.f32 %v348_v16, %v347_v18  ;;  %v281_v16 = vld [vmem:[%s831_s5 + $0x188] sm:$0xff]  ;;  %v392_v18 = vsel %vm296_vm1, %v280_v13, 0.0 }
  0x4d   : > { %v351_v24 = vadd.f32 %v350_v19, %v349_v21  ;;  %v282_v19 = vld [vmem:[%s831_s5 + $0x190] sm:$0xff]  ;;  %v394_v21 = vsel %vm296_vm1, %v281_v16, 0.0 }
  0x4f   : > { %v353_v27 = vadd.f32 %v352_v22, %v351_v24  ;;  %v283_v22 = vld [vmem:[%s831_s5 + $0x198] sm:$0xff]  ;;  %v396_v24 = vsel %vm296_vm1, %v282_v19, 0.0 }
  0x51   : > { %v355_v30 = vadd.f32 %v354_v25, %v353_v27  ;;  %v284_v25 = vld [vmem:[%s831_s5 + $0x1a0] sm:$0xff]  ;;  %v398_v27 = vsel %vm296_vm1, %v283_v22, 0.0 }
  0x53   : > { %v357_v33 = vadd.f32 %v356_v28, %v355_v30  ;;  %v285_v28 = vld [vmem:[%s831_s5 + $0x1a8] sm:$0xff]  ;;  %v400_v30 = vsel %vm296_vm1, %v284_v25, 0.0 }
  0x55   : > { %v359_v36 = vadd.f32 %v358_v31, %v357_v33  ;;  %v286_v31 = vld [vmem:[%s831_s5 + $0x1b0] sm:$0xff]  ;;  %v402_v33 = vsel %vm296_vm1, %v285_v28, 0.0 }
  0x57   : > { %v361_v39 = vadd.f32 %v360_v34, %v359_v36  ;;  %v287_v34 = vld [vmem:[%s831_s5 + $0x1b8] sm:$0xff]  ;;  %v404_v36 = vsel %vm296_vm1, %v286_v31, 0.0 }
  0x59   : > { %v363_v42 = vadd.f32 %v362_v37, %v361_v39  ;;  %v288_v37 = vld [vmem:[%s831_s5 + $0x1c0] sm:$0xff]  ;;  %v406_v39 = vsel %vm296_vm1, %v287_v34, 0.0 }
  0x5b   : > { %v365_v45 = vadd.f32 %v364_v40, %v363_v42  ;;  %v289_v40 = vld [vmem:[%s831_s5 + $0x1c8] sm:$0xff]  ;;  %v408_v42 = vsel %vm296_vm1, %v288_v37, 0.0 }
  0x5d   : > { %v367_v48 = vadd.f32 %v366_v43, %v365_v45  ;;  %v290_v43 = vld [vmem:[%s831_s5 + $0x1d0] sm:$0xff]  ;;  %v410_v45 = vsel %vm296_vm1, %v289_v40, 0.0 }
  0x5f   : > { %v369_v51 = vadd.f32 %v368_v46, %v367_v48  ;;  %v291_v46 = vld [vmem:[%s831_s5 + $0x1d8] sm:$0xff]  ;;  %v412_v48 = vsel %vm296_vm1, %v290_v43, 0.0 }
  0x61   : > { %v371_v54 = vadd.f32 %v370_v49, %v369_v51  ;;  %v292_v49 = vld [vmem:[%s831_s5 + $0x1e0] sm:$0xff]  ;;  %v414_v51 = vsel %vm296_vm1, %v291_v46, 0.0 }
  0x63   : > { %v373_v57 = vadd.f32 %v372_v52, %v371_v54  ;;  %v293_v52 = vld [vmem:[%s831_s5 + $0x1e8] sm:$0xff]  ;;  %v416_v54 = vsel %vm296_vm1, %v292_v49, 0.0 }
  0x65   : > { %v375_v60 = vadd.f32 %v374_v55, %v373_v57  ;;  %v294_v55 = vld [vmem:[%s831_s5 + $0x1f0] sm:$0xff]  ;;  %v418_v57 = vsel %vm296_vm1, %v293_v52, 0.0 }
  0x67   : > { %v377_v63 = vadd.f32 %v376_v58, %v375_v60  ;;  %v295_v58 = vld [vmem:[%s831_s5 + $0x1f8] sm:$0xff]  ;;  %v420_v60 = vsel %vm296_vm1, %v294_v55, 0.0 }
  0x68   : > { %v422_v62 = vsel %vm296_vm1, %v295_v58, 0.0 }
  0x69   : > { %v379_v2 = vadd.f32 %v378_v61, %v377_v63 }
  0x6b   : > { %v381_v5 = vadd.f32 %v380_v0, %v379_v2 }
  0x6d   : > { %v383_v8 = vadd.f32 %v382_v3, %v381_v5 }
  0x6f   : > { %v385_v11 = vadd.f32 %v384_v6, %v383_v8  ;;  %v231_v6 = vld [vmem:[#allocation2] sm:$0x1] }
  0x71   : > { %v387_v14 = vadd.f32 %v386_v9, %v385_v11  ;;  %v463_v11 = vld [vmem:[#allocation5] sm:$0xff] }
  0x72   : > { %482 = vmatpush.msra.mxu1 %v463_v11 }
  0x73   : > { %v389_v17 = vadd.f32 %v388_v12, %v387_v14 }
  0x75   : > { %v391_v20 = vadd.f32 %v390_v15, %v389_v17 }
  0x77   : > { %v393_v23 = vadd.f32 %v392_v18, %v391_v20 }
  0x79   : > { %v395_v26 = vadd.f32 %v394_v21, %v393_v23 }
  0x7b   : > { %v397_v29 = vadd.f32 %v396_v24, %v395_v26 }
  0x7d   : > { %v399_v32 = vadd.f32 %v398_v27, %v397_v29 }
  0x7f   : > { %v401_v35 = vadd.f32 %v400_v30, %v399_v32 }
  0x81   : > { %v403_v38 = vadd.f32 %v402_v33, %v401_v35 }
  0x83   : > { %v405_v41 = vadd.f32 %v404_v36, %v403_v38 }
  0x85   : > { %v407_v44 = vadd.f32 %v406_v39, %v405_v41 }
  0x87   : > { %v409_v47 = vadd.f32 %v408_v42, %v407_v44 }
  0x89   : > { %v411_v50 = vadd.f32 %v410_v45, %v409_v47 }
  0x8b   : > { %v413_v53 = vadd.f32 %v412_v48, %v411_v50 }
  0x8d   : > { %v415_v56 = vadd.f32 %v414_v51, %v413_v53 }
  0x8f   : > { %v417_v59 = vadd.f32 %v416_v54, %v415_v56 }
  0x91   : > { %v419_v61 = vadd.f32 %v418_v57, %v417_v59 }
  0x93   : > { %v421_v63 = vadd.f32 %v420_v60, %v419_v61 }
  0x95   : > { %v423_v0 = vadd.f32 %v422_v62, %v421_v63 }
  0x97   : > { %v424_v1 = vrot.slane %v423_v0, 4 }
  0x99   : > { %v425_v2 = vadd.f32 %v424_v1, %v423_v0 }
  0x9b   : > { %v426_v3 = vrot.slane %v425_v2, 2 }
  0x9d   : > { %v427_v4 = vadd.f32 %v426_v3, %v425_v2 }
  0x9f   : > { %v428_v5 = vrot.slane %v427_v4, 1 }
  0xa1   : > { %v429_v7 = vadd.f32 %v428_v5, %v427_v4 }
  0xa3   : > { %v430_v8 = vadd.f32 %v429_v7, %v231_v6 }
  0xa5   : > { %432 = vst.msk [vmem:[#allocation2] sm:$0x1] %vm229_vm0, %v430_v8 }
  0xac   : > { %v436_v9 = vld [vmem:[#allocation2] sm:$0x1] }
  0xad   : > { %v437_v10 = vmul.f32 0.001953125, %v436_v9 }
  0xaf   : > { %602 = vmatmul.msk.f32.vlgmr.msra.gmra.mxu0 %vm296_vm1, %v437_v10 }
 0x12c   : > { %v459_v12 = vpop.f32.mrf.mxu0 }
 0x12d   : > { %v462_v13 = vmax.f32 %v459_v12, 0.0 }
 0x12f   : > { %603 = vmatmul.msk.f32.vlgmr.msra.gmra.mxu1 %vm296_vm1, %v462_v13 }
 0x1ac   : > { %v484_v14 = vpop.f32.mrf.mxu1 }
 0x1ad   : > { %v604_v15 = vmul.f32 -1.442695, %v484_v14 }
 0x1af   : > { %654 = vpow2.f32 %v604_v15 }
 0x1b5   : > { %v655_v16 = vpop.eup %654 }
 0x1b6   : > { %v490_v17 = vadd.f32 1.0, %v655_v16 }
 0x1b8   : > { %656 = vrcp.f32 %v490_v17  ;;  %v502_v21 = vand.u32 2147483648, %v490_v17  ;;  %v500_v23 = vand.u32 2147483647, %v490_v17  ;;  %vm496_vm3 = vweird.f32 %v490_v17 }
 0x1ba   : > { %v503_v25 = vor.u32 1.1754944e-38, %v502_v21  ;;  %vm501_vm5 = vcmp.eq.f32.partialorder %v500_v23, 8.507059e+37 }
 0x1be   : > { %v657_v18 = vpop.eup %656 }
 0x1bf   : > { %v492_v19 = vmul.f32 %v657_v18, %v490_v17  ;;  %vm497_vm2 = vweird.f32 %v657_v18 }
 0x1c0   : > { %vm498_vm4 = vmor %vm496_vm3, %vm497_vm2 }
 0x1c1   : > { %v493_v20 = vsub.f32 1.0, %v492_v19 }
 0x1c3   : > { %v494_v22 = vmul.f32 %v657_v18, %v493_v20 }
 0x1c5   : > { %v495_v24 = vadd.f32 %v657_v18, %v494_v22 }
 0x1c7   : > { %v499_v26 = vsel %vm498_vm4, %v657_v18, %v495_v24 }
 0x1c8   : > { %v504_v27 = vsel %vm501_vm5, %v503_v25, %v499_v26 }
 0x1c9   : > { %506 = vst.msk [vmem:[%s224_s8] sm:$0x1] %vm229_vm0, %v504_v27 }
 0x1ca PF: > { %s15_s14 = sadd.s32 1, %s748_s14   ;;  %s984_s12 = smov %s744_s13 }
 0x1cb   : > { %p12_p8 = scmp.ge.s32.totalorder %s15_s14, 4   ;;  %s985_s13 = smov %s987_s16 }
 0x1cd   :  { %14 = sbr.rel (!%p12_p8) target bundleno = 3 (0x3), region = 79 }
 0x1d2   :  { %524 = vsyncpa [#allocation4], 1 }
 0x1d3   :  { %526 = vsyncpa [#allocation4 + $0x1], 1 }
 0x1d4   :  { %527 = vsyncpa [#allocation6], 1 }

// kernel: automerge_forward.5
= control target key start
LH: loop header
LB: loop body
LE: loop exit
PB: predicated region body
PF: predicated region fallthrough
CT: control target
= control target key end

     0   :  { %s1454_s12 = smov 0   ;;  %s1456_s13 = smov 0   ;;  %s1682_s0 = inlined_call_operand.vmem [shape: bf16[1024,256], index: 0, kind: input, shape index: {}]   ;;  %s1683_s1 = inlined_call_operand.vmem [shape: bf16[256,128], index: 1, kind: input, shape index: {}]   ;;  %s1684_s2 = inlined_call_operand.vmem [shape: f32[1,128], index: 2, kind: input, shape index: {}]   ;;  %s1685_s3 = inlined_call_operand.vmem [shape: f32[1024,128], index: 3, kind: output, shape index: {}]  }
   0x1   :  { %s1458_s14 = smov 0  }
   0x2 LB: > { %s32_s15 = sadd.s32 1, %s1428_s13  ;;  %p1120_p0 = scmp.ge.s32.totalorder %s1432_s14, 1  ;;  %s1432_s14 = sphi %s1458_s14, %s13_s14   ;;  %s1428_s13 = sphi %s1456_s13, %s1687_s13   ;;  %s1424_s12 = sphi %s1454_s12, %s1686_s12  }
   0x3   : > { %p34_p1 = scmp.ge.s32.totalorder %s32_s15, 4  ;;  %p191_p2 = scmp.lt.s32.totalorder %s1432_s14, 5 }
   0x5   : > { %s1689_s15 = smov (%p34_p1, %s32_s15), 0  ;;  %p192_p3 = pnand %p1120_p0, %p191_p2 }
   0x6   : > { %s1121_s28 = sshll.u32 (!%p192_p3), %s1424_s12, 5 }
   0x7   : > { %195 = sbr.rel (%p192_p3) target bundleno = 302 (0x12e), region = 32  ;;  %p236_p4 = scmp.lt.s32.totalorder (!%p192_p3), %s1121_s28, 127 }
   0xc   : > { %v1360_v0 = vld [vmem:[%s1683_s1 + $0x38] sm:$0xff]  ;;  %v1359_v2 = vld [vmem:[%s1683_s1 + $0x30] sm:$0xff]  ;;  %v1358_v4 = vld [vmem:[%s1683_s1 + $0x28] sm:$0xff]  ;;  %s1691_s28 = smov (!%p236_p4, %s1121_s28), 127 }
   0xd   : > { %v1368_v1 = vld [vmem:[%s1683_s1 + $0x78] sm:$0xff]  ;;  %655 = vmatpush.bf16.msra.mxu0 %v1360_v0  ;;  %1369 = vmatpush.bf16.msra.mxu2 %v1360_v0  ;;  %v1367_v3 = vld [vmem:[%s1683_s1 + $0x70] sm:$0xff]  ;;  %v1366_v5 = vld [vmem:[%s1683_s1 + $0x68] sm:$0xff]  ;;  %s1320_s17 = sshll.u32 %s1691_s28, 3 }
   0xe   : > { %744 = vmatpush.bf16.msra.mxu1 %v1368_v1  ;;  %1377 = vmatpush.bf16.msra.mxu3 %v1368_v1  ;;  %v1357_v6 = vld [vmem:[%s1683_s1 + $0x20] sm:$0xff]  ;;  %v1356_v8 = vld [vmem:[%s1683_s1 + $0x18] sm:$0xff]  ;;  %v1355_v10 = vld [vmem:[%s1683_s1 + $0x10] sm:$0xff]  ;;  %s1522_s22 = scalar_lea.vmem %s1682_s0, %s1320_s17  ;;  %s1607_s7 = scalar_lea.vmem %s1685_s3, %s1320_s17 }
   0xf   : > { %v1365_v7 = vld [vmem:[%s1683_s1 + $0x60] sm:$0xff]  ;;  %v1364_v9 = vld [vmem:[%s1683_s1 + $0x58] sm:$0xff]  ;;  %v1363_v11 = vld [vmem:[%s1683_s1 + $0x50] sm:$0xff] }
  0x10   : > { %v1354_v12 = vld [vmem:[%s1683_s1 + $0x8] sm:$0xff]  ;;  %v1353_v14 = vld [vmem:[%s1683_s1] sm:$0xff]  ;;  %v1136_v28 = vld [vmem:[%s1522_s22 + $0x10] sm:$0xf] }
  0x11   : > { %656 = vmatpush.bf16.msra.mxu0 %v1359_v2  ;;  %1370 = vmatpush.bf16.msra.mxu2 %v1359_v2  ;;  %v1362_v13 = vld [vmem:[%s1683_s1 + $0x48] sm:$0xff]  ;;  %v1361_v15 = vld [vmem:[%s1683_s1 + $0x40] sm:$0xff]  ;;  %v1324_v29 = vld [vmem:[%s1522_s22 + $0x14] sm:$0xf0] }
  0x12   : > { %745 = vmatpush.bf16.msra.mxu1 %v1367_v3  ;;  %1378 = vmatpush.bf16.msra.mxu3 %v1367_v3  ;;  %v1128_v16 = vld [vmem:[%s1522_s22] sm:$0xf]  ;;  %v1322_v17 = vld [vmem:[%s1522_s22 + $0x4] sm:$0xf0]  ;;  %v1321_v20 = vld [vmem:[%s1522_s22 + $0x4] sm:$0xf]  ;;  %v1137_v36 = vor.u32 %v1324_v29, %v1136_v28 }
  0x13   : > { %v1192_v18 = vld [vmem:[%s1522_s22 + $0x80] sm:$0xf]  ;;  %v1338_v19 = vld [vmem:[%s1522_s22 + $0x84] sm:$0xf0]  ;;  %v1130_v21 = vld [vmem:[%s1522_s22 + $0x8] sm:$0xf0]  ;;  %v1129_v24 = vor.u32 %v1322_v17, %v1128_v16 }
  0x14   : > { %v1337_v22 = vld [vmem:[%s1522_s22 + $0x84] sm:$0xf]  ;;  %v1194_v23 = vld [vmem:[%s1522_s22 + $0x88] sm:$0xf0]  ;;  %v1193_v25 = vor.u32 %v1338_v19, %v1192_v18  ;;  %v1133_v26 = vor.u32 %v1321_v20, %v1130_v21  ;;  %v1200_v30 = vld [vmem:[%s1522_s22 + $0x90] sm:$0xf] }
  0x15   : > { %657 = vmatpush.bf16.msra.mxu0 %v1358_v4  ;;  %1371 = vmatpush.bf16.msra.mxu2 %v1358_v4  ;;  %v1197_v27 = vor.u32 %v1337_v22, %v1194_v23  ;;  %v1340_v31 = vld [vmem:[%s1522_s22 + $0x94] sm:$0xf0]  ;;  %v1323_v32 = vld [vmem:[%s1522_s22 + $0x14] sm:$0xf]  ;;  %v1138_v33 = vld [vmem:[%s1522_s22 + $0x18] sm:$0xf0] }
  0x16   : > { %746 = vmatpush.bf16.msra.mxu1 %v1366_v5  ;;  %1379 = vmatpush.bf16.msra.mxu3 %v1366_v5  ;;  %v1339_v34 = vld [vmem:[%s1522_s22 + $0x94] sm:$0xf]  ;;  %v1202_v35 = vld [vmem:[%s1522_s22 + $0x98] sm:$0xf0]  ;;  %v1201_v37 = vor.u32 %v1340_v31, %v1200_v30  ;;  %v1141_v38 = vor.u32 %v1323_v32, %v1138_v33  ;;  %v1144_v40 = vld [vmem:[%s1522_s22 + $0x20] sm:$0xf] }
  0x17   : > { %v1205_v39 = vor.u32 %v1339_v34, %v1202_v35  ;;  %v1326_v41 = vld [vmem:[%s1522_s22 + $0x24] sm:$0xf0]  ;;  %v1208_v42 = vld [vmem:[%s1522_s22 + $0xa0] sm:$0xf]  ;;  %v1325_v44 = vld [vmem:[%s1522_s22 + $0x24] sm:$0xf] }
  0x18   : > { %v1342_v43 = vld [vmem:[%s1522_s22 + $0xa4] sm:$0xf0]  ;;  %v1146_v45 = vld [vmem:[%s1522_s22 + $0x28] sm:$0xf0]  ;;  %v1341_v46 = vld [vmem:[%s1522_s22 + $0xa4] sm:$0xf]  ;;  %v1145_v48 = vor.u32 %v1326_v41, %v1144_v40 }
  0x19   : > { %658 = vmatpush.bf16.msra.mxu0 %v1357_v6  ;;  %1372 = vmatpush.bf16.msra.mxu2 %v1357_v6  ;;  %v1210_v47 = vld [vmem:[%s1522_s22 + $0xa8] sm:$0xf0]  ;;  %v1209_v49 = vor.u32 %v1342_v43, %v1208_v42  ;;  %v1149_v50 = vor.u32 %v1325_v44, %v1146_v45  ;;  %v1152_v52 = vld [vmem:[%s1522_s22 + $0x30] sm:$0xf]  ;;  %v1328_v53 = vld [vmem:[%s1522_s22 + $0x34] sm:$0xf0] }
  0x1a   : > { %747 = vmatpush.bf16.msra.mxu1 %v1365_v7  ;;  %1380 = vmatpush.bf16.msra.mxu3 %v1365_v7  ;;  %v1213_v51 = vor.u32 %v1341_v46, %v1210_v47  ;;  %v1216_v54 = vld [vmem:[%s1522_s22 + $0xb0] sm:$0xf]  ;;  %v1344_v55 = vld [vmem:[%s1522_s22 + $0xb4] sm:$0xf0]  ;;  %v1327_v56 = vld [vmem:[%s1522_s22 + $0x34] sm:$0xf]  ;;  %v1153_v60 = vor.u32 %v1328_v53, %v1152_v52 }
  0x1b   : > { %v1154_v57 = vld [vmem:[%s1522_s22 + $0x38] sm:$0xf0]  ;;  %v1343_v58 = vld [vmem:[%s1522_s22 + $0xb4] sm:$0xf]  ;;  %v1217_v61 = vor.u32 %v1344_v55, %v1216_v54  ;;  %v1160_v0 = vld [vmem:[%s1522_s22 + $0x40] sm:$0xf] }
  0x1c   : > { %v1218_v59 = vld [vmem:[%s1522_s22 + $0xb8] sm:$0xf0]  ;;  %v1157_v62 = vor.u32 %v1327_v56, %v1154_v57  ;;  %v1330_v1 = vld [vmem:[%s1522_s22 + $0x44] sm:$0xf0]  ;;  %v1224_v2 = vld [vmem:[%s1522_s22 + $0xc0] sm:$0xf] }
  0x1d   : > { %659 = vmatpush.bf16.msra.mxu0 %v1356_v8  ;;  %1373 = vmatpush.bf16.msra.mxu2 %v1356_v8  ;;  %v1221_v63 = vor.u32 %v1343_v58, %v1218_v59  ;;  %v1346_v3 = vld [vmem:[%s1522_s22 + $0xc4] sm:$0xf0]  ;;  %v1329_v4 = vld [vmem:[%s1522_s22 + $0x44] sm:$0xf]  ;;  %v1162_v5 = vld [vmem:[%s1522_s22 + $0x48] sm:$0xf0]  ;;  %v1161_v8 = vor.u32 %v1330_v1, %v1160_v0 }
  0x1e   : > { %748 = vmatpush.bf16.msra.mxu1 %v1364_v9  ;;  %1381 = vmatpush.bf16.msra.mxu3 %v1364_v9  ;;  %v1345_v6 = vld [vmem:[%s1522_s22 + $0xc4] sm:$0xf]  ;;  %v1226_v7 = vld [vmem:[%s1522_s22 + $0xc8] sm:$0xf0]  ;;  %v1225_v9 = vor.u32 %v1346_v3, %v1224_v2  ;;  %v1331_v16 = vld [vmem:[%s1522_s22 + $0x54] sm:$0xf] }
  0x1f   : > { %v1170_v17 = vld [vmem:[%s1522_s22 + $0x58] sm:$0xf0]  ;;  %v1347_v18 = vld [vmem:[%s1522_s22 + $0xd4] sm:$0xf]  ;;  %v1333_v28 = vld [vmem:[%s1522_s22 + $0x64] sm:$0xf] }
  0x20   : > { %v1234_v19 = vld [vmem:[%s1522_s22 + $0xd8] sm:$0xf0]  ;;  %v1173_v22 = vor.u32 %v1331_v16, %v1170_v17  ;;  %v1178_v29 = vld [vmem:[%s1522_s22 + $0x68] sm:$0xf0]  ;;  %v1349_v30 = vld [vmem:[%s1522_s22 + $0xe4] sm:$0xf] }
  0x21   : > { %660 = vmatpush.bf16.msra.mxu0 %v1355_v10  ;;  %1374 = vmatpush.bf16.msra.mxu2 %v1355_v10  ;;  %v1165_v10 = vor.u32 %v1329_v4, %v1162_v5  ;;  %v1237_v23 = vor.u32 %v1347_v18, %v1234_v19  ;;  %v1242_v31 = vld [vmem:[%s1522_s22 + $0xe8] sm:$0xf0]  ;;  %v1181_v34 = vor.u32 %v1333_v28, %v1178_v29  ;;  %v1335_v40 = vld [vmem:[%s1522_s22 + $0x74] sm:$0xf]  ;;  %v1186_v41 = vld [vmem:[%s1522_s22 + $0x78] sm:$0xf0] }
  0x22   : > { %749 = vmatpush.bf16.msra.mxu1 %v1363_v11  ;;  %1382 = vmatpush.bf16.msra.mxu3 %v1363_v11  ;;  %v1229_v11 = vor.u32 %v1345_v6, %v1226_v7  ;;  %v1245_v35 = vor.u32 %v1349_v30, %v1242_v31  ;;  %v1351_v42 = vld [vmem:[%s1522_s22 + $0xf4] sm:$0xf]  ;;  %v1250_v43 = vld [vmem:[%s1522_s22 + $0xf8] sm:$0xf0]  ;;  %v1189_v46 = vor.u32 %v1335_v40, %v1186_v41 }
  0x23   : > { %v1253_v47 = vor.u32 %v1351_v42, %v1250_v43 }
  0x25   : > { %661 = vmatpush.bf16.msra.mxu0 %v1354_v12  ;;  %1375 = vmatpush.bf16.msra.mxu2 %v1354_v12  ;;  %v1168_v12 = vld [vmem:[%s1522_s22 + $0x50] sm:$0xf] }
  0x26   : > { %750 = vmatpush.bf16.msra.mxu1 %v1362_v13  ;;  %1383 = vmatpush.bf16.msra.mxu3 %v1362_v13  ;;  %v1332_v13 = vld [vmem:[%s1522_s22 + $0x54] sm:$0xf0] }
  0x27   : > { %v1169_v20 = vor.u32 %v1332_v13, %v1168_v12 }
  0x29   : > { %662 = vmatpush.bf16.msra.mxu0 %v1353_v14  ;;  %1376 = vmatpush.bf16.msra.mxu2 %v1353_v14  ;;  %v1232_v14 = vld [vmem:[%s1522_s22 + $0xd0] sm:$0xf] }
  0x2a   : > { %751 = vmatpush.bf16.msra.mxu1 %v1361_v15  ;;  %1384 = vmatpush.bf16.msra.mxu3 %v1361_v15  ;;  %v1348_v15 = vld [vmem:[%s1522_s22 + $0xd4] sm:$0xf0] }
  0x2b   : > { %v1233_v21 = vor.u32 %v1348_v15, %v1232_v14 }
  0x2c   : > { %663 = vmatmul.bf16.vlgmr.msra.gmra.mxu0 %v1129_v24  ;;  %703 = vmatmul.bf16.vlgmr.msra.gmra.mxu2 %v1193_v25  ;;  %v1176_v24 = vld [vmem:[%s1522_s22 + $0x60] sm:$0xf]  ;;  %v1334_v25 = vld [vmem:[%s1522_s22 + $0x64] sm:$0xf0] }
  0x2d   : > { %752 = vmatmul.bf16.vlgmr.msra.gmra.mxu1 %v1133_v26  ;;  %792 = vmatmul.bf16.vlgmr.msra.gmra.mxu3 %v1197_v27  ;;  %v1240_v26 = vld [vmem:[%s1522_s22 + $0xe0] sm:$0xf]  ;;  %v1350_v27 = vld [vmem:[%s1522_s22 + $0xe4] sm:$0xf0]  ;;  %v1177_v32 = vor.u32 %v1334_v25, %v1176_v24 }
  0x2e   : > { %v1241_v33 = vor.u32 %v1350_v27, %v1240_v26 }
  0x3c   : > { %668 = vmatmul.bf16.gmra.mxu0 %v1137_v36  ;;  %708 = vmatmul.bf16.gmra.mxu2 %v1201_v37  ;;  %v1184_v36 = vld [vmem:[%s1522_s22 + $0x70] sm:$0xf]  ;;  %v1336_v37 = vld [vmem:[%s1522_s22 + $0x74] sm:$0xf0] }
  0x3d   : > { %757 = vmatmul.bf16.gmra.mxu1 %v1141_v38  ;;  %797 = vmatmul.bf16.gmra.mxu3 %v1205_v39  ;;  %v1248_v38 = vld [vmem:[%s1522_s22 + $0xf0] sm:$0xf]  ;;  %v1352_v39 = vld [vmem:[%s1522_s22 + $0xf4] sm:$0xf0]  ;;  %v1185_v44 = vor.u32 %v1336_v37, %v1184_v36 }
  0x3e   : > { %v1249_v45 = vor.u32 %v1352_v39, %v1248_v38 }
  0x4c   : > { %673 = vmatmul.bf16.gmra.mxu0 %v1145_v48  ;;  %713 = vmatmul.bf16.gmra.mxu2 %v1209_v49  ;;  %v1600_v49 = vld [vmem:[%s1684_s2] ss:$0 sm:$0xff] }
  0x4d   : > { %762 = vmatmul.bf16.gmra.mxu1 %v1149_v50  ;;  %802 = vmatmul.bf16.gmra.mxu3 %v1213_v51 }
  0x5c   : > { %678 = vmatmul.bf16.gmra.mxu0 %v1153_v60  ;;  %718 = vmatmul.bf16.gmra.mxu2 %v1217_v61 }
  0x5d   : > { %767 = vmatmul.bf16.gmra.mxu1 %v1157_v62  ;;  %807 = vmatmul.bf16.gmra.mxu3 %v1221_v63 }
  0x6c   : > { %683 = vmatmul.bf16.gmra.mxu0 %v1161_v8  ;;  %723 = vmatmul.bf16.gmra.mxu2 %v1225_v9 }
  0x6d   : > { %772 = vmatmul.bf16.gmra.mxu1 %v1165_v10  ;;  %812 = vmatmul.bf16.gmra.mxu3 %v1229_v11 }
  0x7c   : > { %688 = vmatmul.bf16.gmra.mxu0 %v1169_v20  ;;  %728 = vmatmul.bf16.gmra.mxu2 %v1233_v21 }
  0x7d   : > { %777 = vmatmul.bf16.gmra.mxu1 %v1173_v22  ;;  %817 = vmatmul.bf16.gmra.mxu3 %v1237_v23 }
  0x8c   : > { %693 = vmatmul.bf16.gmra.mxu0 %v1177_v32  ;;  %733 = vmatmul.bf16.gmra.mxu2 %v1241_v33 }
  0x8d   : > { %782 = vmatmul.bf16.gmra.mxu1 %v1181_v34  ;;  %822 = vmatmul.bf16.gmra.mxu3 %v1245_v35 }
  0x9c   : > { %698 = vmatmul.bf16.gmra.mxu0 %v1185_v44  ;;  %738 = vmatmul.bf16.gmra.mxu2 %v1249_v45 }
  0x9d   : > { %787 = vmatmul.bf16.gmra.mxu1 %v1189_v46  ;;  %827 = vmatmul.bf16.gmra.mxu3 %v1253_v47 }
  0xa9   : > { %v664_v48 = vpop.f32.mrf.mxu0 }
  0xaa   : > { %v753_v50 = vpop.f32.mrf.mxu1 }
  0xab   : > { %v754_v51 = vadd.f32 %v753_v50, %v664_v48 }
  0xad   : > { %v936_v52 = vadd.f32 %v1600_v49, %v754_v51 }
  0xaf   : > { %968 = vst [vmem:[%s1607_s7] sm:$0xff] %v936_v52  ;;  %v704_v53 = vpop.f32.mrf.mxu2 }
  0xb0   : > { %v793_v54 = vpop.f32.mrf.mxu3 }
  0xb1   : > { %v794_v55 = vadd.f32 %v793_v54, %v704_v53  ;;  %v666_v56 = vpop.f32.mrf.mxu0 }
  0xb2   : > { %v755_v57 = vpop.f32.mrf.mxu1 }
  0xb3   : > { %v952_v58 = vadd.f32 %v1600_v49, %v794_v55  ;;  %v756_v59 = vadd.f32 %v755_v57, %v666_v56 }
  0xb5   : > { %984 = vst [vmem:[%s1607_s7 + $0x80] sm:$0xff] %v952_v58  ;;  %v937_v60 = vadd.f32 %v1600_v49, %v756_v59 }
  0xb7   : > { %969 = vst [vmem:[%s1607_s7 + $0x8] sm:$0xff] %v937_v60  ;;  %v706_v61 = vpop.f32.mrf.mxu2 }
  0xb8   : > { %v795_v62 = vpop.f32.mrf.mxu3 }
  0xb9   : > { %v796_v63 = vadd.f32 %v795_v62, %v706_v61  ;;  %v669_v0 = vpop.f32.mrf.mxu0 }
  0xba   : > { %v758_v1 = vpop.f32.mrf.mxu1 }
  0xbb   : > { %v953_v2 = vadd.f32 %v1600_v49, %v796_v63  ;;  %v759_v3 = vadd.f32 %v758_v1, %v669_v0 }
  0xbd   : > { %985 = vst [vmem:[%s1607_s7 + $0x88] sm:$0xff] %v953_v2  ;;  %v938_v4 = vadd.f32 %v1600_v49, %v759_v3 }
  0xbf   : > { %970 = vst [vmem:[%s1607_s7 + $0x10] sm:$0xff] %v938_v4  ;;  %v709_v5 = vpop.f32.mrf.mxu2 }
  0xc0   : > { %v798_v6 = vpop.f32.mrf.mxu3 }
  0xc1   : > { %v799_v7 = vadd.f32 %v798_v6, %v709_v5  ;;  %v671_v8 = vpop.f32.mrf.mxu0 }
  0xc2   : > { %v760_v9 = vpop.f32.mrf.mxu1 }
  0xc3   : > { %v954_v10 = vadd.f32 %v1600_v49, %v799_v7  ;;  %v761_v11 = vadd.f32 %v760_v9, %v671_v8 }
  0xc5   : > { %986 = vst [vmem:[%s1607_s7 + $0x90] sm:$0xff] %v954_v10  ;;  %v939_v12 = vadd.f32 %v1600_v49, %v761_v11 }
  0xc7   : > { %971 = vst [vmem:[%s1607_s7 + $0x18] sm:$0xff] %v939_v12  ;;  %v711_v13 = vpop.f32.mrf.mxu2 }
  0xc8   : > { %v800_v14 = vpop.f32.mrf.mxu3 }
  0xc9   : > { %v801_v15 = vadd.f32 %v800_v14, %v711_v13  ;;  %v674_v16 = vpop.f32.mrf.mxu0 }
  0xca   : > { %v763_v17 = vpop.f32.mrf.mxu1 }
  0xcb   : > { %v955_v18 = vadd.f32 %v1600_v49, %v801_v15  ;;  %v764_v19 = vadd.f32 %v763_v17, %v674_v16 }
  0xcd   : > { %987 = vst [vmem:[%s1607_s7 + $0x98] sm:$0xff] %v955_v18  ;;  %v940_v20 = vadd.f32 %v1600_v49, %v764_v19 }
  0xcf   : > { %972 = vst [vmem:[%s1607_s7 + $0x20] sm:$0xff] %v940_v20  ;;  %v714_v21 = vpop.f32.mrf.mxu2 }
  0xd0   : > { %v803_v22 = vpop.f32.mrf.mxu3 }
  0xd1   : > { %v804_v23 = vadd.f32 %v803_v22, %v714_v21  ;;  %v676_v24 = vpop.f32.mrf.mxu0 }
  0xd2   : > { %v765_v25 = vpop.f32.mrf.mxu1 }
  0xd3   : > { %v956_v26 = vadd.f32 %v1600_v49, %v804_v23  ;;  %v766_v27 = vadd.f32 %v765_v25, %v676_v24 }
  0xd5   : > { %988 = vst [vmem:[%s1607_s7 + $0xa0] sm:$0xff] %v956_v26  ;;  %v941_v28 = vadd.f32 %v1600_v49, %v766_v27 }
  0xd7   : > { %973 = vst [vmem:[%s1607_s7 + $0x28] sm:$0xff] %v941_v28  ;;  %v716_v29 = vpop.f32.mrf.mxu2 }
  0xd8   : > { %v805_v30 = vpop.f32.mrf.mxu3 }
  0xd9   : > { %v806_v31 = vadd.f32 %v805_v30, %v716_v29  ;;  %v679_v32 = vpop.f32.mrf.mxu0 }
  0xda   : > { %v768_v33 = vpop.f32.mrf.mxu1 }
  0xdb   : > { %v957_v34 = vadd.f32 %v1600_v49, %v806_v31  ;;  %v769_v35 = vadd.f32 %v768_v33, %v679_v32 }
  0xdd   : > { %989 = vst [vmem:[%s1607_s7 + $0xa8] sm:$0xff] %v957_v34  ;;  %v942_v36 = vadd.f32 %v1600_v49, %v769_v35 }
  0xdf   : > { %974 = vst [vmem:[%s1607_s7 + $0x30] sm:$0xff] %v942_v36  ;;  %v719_v37 = vpop.f32.mrf.mxu2 }
  0xe0   : > { %v808_v38 = vpop.f32.mrf.mxu3 }
  0xe1   : > { %v809_v39 = vadd.f32 %v808_v38, %v719_v37  ;;  %v681_v40 = vpop.f32.mrf.mxu0 }
  0xe2   : > { %v770_v41 = vpop.f32.mrf.mxu1 }
  0xe3   : > { %v958_v42 = vadd.f32 %v1600_v49, %v809_v39  ;;  %v771_v43 = vadd.f32 %v770_v41, %v681_v40 }
  0xe5   : > { %990 = vst [vmem:[%s1607_s7 + $0xb0] sm:$0xff] %v958_v42  ;;  %v943_v44 = vadd.f32 %v1600_v49, %v771_v43 }
  0xe7   : > { %975 = vst [vmem:[%s1607_s7 + $0x38] sm:$0xff] %v943_v44  ;;  %v721_v45 = vpop.f32.mrf.mxu2 }
  0xe8   : > { %v810_v46 = vpop.f32.mrf.mxu3 }
  0xe9   : > { %v811_v47 = vadd.f32 %v810_v46, %v721_v45  ;;  %v684_v48 = vpop.f32.mrf.mxu0 }
  0xea   : > { %v773_v50 = vpop.f32.mrf.mxu1 }
  0xeb   : > { %v959_v51 = vadd.f32 %v1600_v49, %v811_v47  ;;  %v774_v52 = vadd.f32 %v773_v50, %v684_v48 }
  0xed   : > { %991 = vst [vmem:[%s1607_s7 + $0xb8] sm:$0xff] %v959_v51  ;;  %v944_v53 = vadd.f32 %v1600_v49, %v774_v52 }
  0xef   : > { %976 = vst [vmem:[%s1607_s7 + $0x40] sm:$0xff] %v944_v53  ;;  %v724_v54 = vpop.f32.mrf.mxu2 }
  0xf0   : > { %v813_v55 = vpop.f32.mrf.mxu3 }
  0xf1   : > { %v814_v56 = vadd.f32 %v813_v55, %v724_v54  ;;  %v686_v57 = vpop.f32.mrf.mxu0 }
  0xf2   : > { %v775_v58 = vpop.f32.mrf.mxu1 }
  0xf3   : > { %v960_v59 = vadd.f32 %v1600_v49, %v814_v56  ;;  %v776_v60 = vadd.f32 %v775_v58, %v686_v57 }
  0xf5   : > { %992 = vst [vmem:[%s1607_s7 + $0xc0] sm:$0xff] %v960_v59  ;;  %v945_v61 = vadd.f32 %v1600_v49, %v776_v60 }
  0xf7   : > { %977 = vst [vmem:[%s1607_s7 + $0x48] sm:$0xff] %v945_v61  ;;  %v726_v62 = vpop.f32.mrf.mxu2 }
  0xf8   : > { %v815_v63 = vpop.f32.mrf.mxu3 }
  0xf9   : > { %v816_v0 = vadd.f32 %v815_v63, %v726_v62  ;;  %v689_v1 = vpop.f32.mrf.mxu0 }
  0xfa   : > { %v778_v2 = vpop.f32.mrf.mxu1 }
  0xfb   : > { %v961_v3 = vadd.f32 %v1600_v49, %v816_v0  ;;  %v779_v4 = vadd.f32 %v778_v2, %v689_v1 }
  0xfd   : > { %993 = vst [vmem:[%s1607_s7 + $0xc8] sm:$0xff] %v961_v3  ;;  %v946_v5 = vadd.f32 %v1600_v49, %v779_v4 }
  0xff   : > { %978 = vst [vmem:[%s1607_s7 + $0x50] sm:$0xff] %v946_v5  ;;  %v729_v6 = vpop.f32.mrf.mxu2 }
 0x100   : > { %v818_v7 = vpop.f32.mrf.mxu3 }
 0x101   : > { %v819_v8 = vadd.f32 %v818_v7, %v729_v6  ;;  %v691_v9 = vpop.f32.mrf.mxu0 }
 0x102   : > { %v780_v10 = vpop.f32.mrf.mxu1 }
 0x103   : > { %v962_v11 = vadd.f32 %v1600_v49, %v819_v8  ;;  %v781_v12 = vadd.f32 %v780_v10, %v691_v9 }
 0x105   : > { %994 = vst [vmem:[%s1607_s7 + $0xd0] sm:$0xff] %v962_v11  ;;  %v947_v13 = vadd.f32 %v1600_v49, %v781_v12 }
 0x107   : > { %979 = vst [vmem:[%s1607_s7 + $0x58] sm:$0xff] %v947_v13  ;;  %v731_v14 = vpop.f32.mrf.mxu2 }
 0x108   : > { %v820_v15 = vpop.f32.mrf.mxu3 }
 0x109   : > { %v821_v16 = vadd.f32 %v820_v15, %v731_v14  ;;  %v694_v17 = vpop.f32.mrf.mxu0 }
 0x10a   : > { %v783_v18 = vpop.f32.mrf.mxu1 }
 0x10b   : > { %v963_v19 = vadd.f32 %v1600_v49, %v821_v16  ;;  %v784_v20 = vadd.f32 %v783_v18, %v694_v17 }
 0x10d   : > { %995 = vst [vmem:[%s1607_s7 + $0xd8] sm:$0xff] %v963_v19  ;;  %v948_v21 = vadd.f32 %v1600_v49, %v784_v20 }
 0x10f   : > { %980 = vst [vmem:[%s1607_s7 + $0x60] sm:$0xff] %v948_v21  ;;  %v734_v22 = vpop.f32.mrf.mxu2 }
 0x110   : > { %v823_v23 = vpop.f32.mrf.mxu3 }
 0x111   : > { %v824_v24 = vadd.f32 %v823_v23, %v734_v22  ;;  %v696_v25 = vpop.f32.mrf.mxu0 }
 0x112   : > { %v785_v26 = vpop.f32.mrf.mxu1 }
 0x113   : > { %v964_v27 = vadd.f32 %v1600_v49, %v824_v24  ;;  %v786_v28 = vadd.f32 %v785_v26, %v696_v25 }
 0x115   : > { %996 = vst [vmem:[%s1607_s7 + $0xe0] sm:$0xff] %v964_v27  ;;  %v949_v29 = vadd.f32 %v1600_v49, %v786_v28 }
 0x117   : > { %981 = vst [vmem:[%s1607_s7 + $0x68] sm:$0xff] %v949_v29  ;;  %v736_v30 = vpop.f32.mrf.mxu2 }
 0x118   : > { %v825_v31 = vpop.f32.mrf.mxu3 }
 0x119   : > { %v826_v32 = vadd.f32 %v825_v31, %v736_v30  ;;  %v699_v33 = vpop.f32.mrf.mxu0 }
 0x11a   : > { %v788_v34 = vpop.f32.mrf.mxu1 }
 0x11b   : > { %v965_v35 = vadd.f32 %v1600_v49, %v826_v32  ;;  %v789_v36 = vadd.f32 %v788_v34, %v699_v33 }
 0x11d   : > { %997 = vst [vmem:[%s1607_s7 + $0xe8] sm:$0xff] %v965_v35  ;;  %v950_v37 = vadd.f32 %v1600_v49, %v789_v36 }
 0x11f   : > { %982 = vst [vmem:[%s1607_s7 + $0x70] sm:$0xff] %v950_v37  ;;  %v739_v38 = vpop.f32.mrf.mxu2 }
 0x120   : > { %v828_v39 = vpop.f32.mrf.mxu3 }
 0x121   : > { %v829_v40 = vadd.f32 %v828_v39, %v739_v38  ;;  %v701_v41 = vpop.f32.mrf.mxu0 }
 0x122   : > { %v790_v42 = vpop.f32.mrf.mxu1 }
 0x123   : > { %v966_v43 = vadd.f32 %v1600_v49, %v829_v40  ;;  %v791_v44 = vadd.f32 %v790_v42, %v701_v41 }
 0x125   : > { %998 = vst [vmem:[%s1607_s7 + $0xf0] sm:$0xff] %v966_v43  ;;  %v951_v45 = vadd.f32 %v1600_v49, %v791_v44 }
 0x127   : > { %983 = vst [vmem:[%s1607_s7 + $0x78] sm:$0xff] %v951_v45  ;;  %v741_v46 = vpop.f32.mrf.mxu2 }
 0x128   : > { %v830_v47 = vpop.f32.mrf.mxu3 }
 0x129   : > { %v831_v48 = vadd.f32 %v830_v47, %v741_v46 }
 0x12b   : > { %v967_v50 = vadd.f32 %v1600_v49, %v831_v48 }
 0x12d   : > { %999 = vst [vmem:[%s1607_s7 + $0xf8] sm:$0xff] %v967_v50 }
 0x12e PF: > { %s13_s14 = sadd.s32 1, %s1432_s14   ;;  %s1686_s12 = smov %s1428_s13 }
 0x12f   : > { %p10_p5 = scmp.ge.s32.totalorder %s13_s14, 6   ;;  %s1687_s13 = smov %s1689_s15 }
 0x131   :  { %12 = sbr.rel (!%p10_p5) target bundleno = 2 (0x2), region = 76 }

</bundles_post_ra>
